<compile_context>
chip_gen: v5e
topology: v5e:2x2
jax: 0.10.0
libtpu: 0.0.40
codegen_flags: <defaults>
</compile_context>

<pallas_src>
import jax
import jax.numpy as jnp
from jax.experimental import pallas as pl
from jax.experimental.pallas import tpu as pltpu


# ----------------------------- Pallas kernel --------------------------------
def vae_forward_kernel(
    xin_ref,            # (TB, 8)  f32: [x0 x1 x2 | eps0 eps1 | 0 0 0]
    w1_ref, b1_ref,     # (8, 128)  bf16 (rows 3:8 zero), (1, 128) f32
    w2_ref, b2_ref,     # (128, 256) bf16
    w3_ref, b3_ref,     # (256, 512) bf16
    w4_ref, b4_ref,     # (512, 4)  bf16  -- fused [mu | logvar] head
    w5_ref, b5_ref,     # (8, 512)  bf16 (rows 2:8 zero)
    w6_ref, b6_ref,     # (512, 256) bf16
    w7_ref, b7_ref,     # (256, 128) bf16
    w8_ref, b8_ref,     # (128, 3)  bf16
    out_ref,            # (TB, 7)  f32: [recon(3) | mu(2) | logvar(2)]
):
    f32, bf16 = jnp.float32, jnp.bfloat16

    def mm(h_bf16, w_ref, b_ref):
        # bf16 MXU matmul, f32 accumulation, f32 bias add.
        return jnp.dot(h_bf16, w_ref[...], preferred_element_type=f32) + b_ref[...]

    def relu_bf16(acc_f32):
        # ReLU in f32 (v5e VPU has no bf16); carry the activation as bf16.
        return jnp.maximum(acc_f32, 0.0).astype(bf16)

    tb = xin_ref.shape[0]
    xin = xin_ref[...]                        # (TB, 8) f32
    eps = xin[:, 3:5]                         # f32 for the reparametrization
    x8 = xin.astype(bf16)                     # eps / zero cols hit zero rows of w1

    # ---------------- encoder (all MXU) ----------------
    h = relu_bf16(mm(x8, w1_ref, b1_ref))     # (TB, 128)
    h = relu_bf16(mm(h, w2_ref, b2_ref))      # (TB, 256)
    h = relu_bf16(mm(h, w3_ref, b3_ref))      # (TB, 512)
    head = mm(h, w4_ref, b4_ref)              # (TB, 4) f32 = [mu | logvar]
    mu = head[:, 0:2]
    logvar = head[:, 2:4]

    # ---------------- reparametrize (f32, VPU/EUP) ----------------
    # NOTE: padded batch rows only see bias-derived values here; they are
    # sliced off in the wrapper, so this is harmless.
    z = eps * jnp.exp(0.5 * logvar) + mu      # (TB, 2)

    # ---------------- decoder (all MXU) ----------------
    # Zero-pad z's contraction dim to 8; the padded cols hit zero rows of w5.
    z8 = jnp.concatenate([z, jnp.zeros((tb, 6), f32)], axis=1).astype(bf16)
    d = relu_bf16(mm(z8, w5_ref, b5_ref))     # (TB, 512)
    d = relu_bf16(mm(d, w6_ref, b6_ref))      # (TB, 256)
    d = relu_bf16(mm(d, w7_ref, b7_ref))      # (TB, 128)
    logits = mm(d, w8_ref, b8_ref)            # (TB, 3) f32
    recon = 1.0 / (1.0 + jnp.exp(-logits))    # exact sigmoid, stays in [0, 1]

    # Single lane-fused output slab: [recon | mu | logvar].
    out_ref[...] = jnp.concatenate([recon, head], axis=1).astype(out_ref.dtype)


# ------------------------------- wrapper -------------------------------------
def _ceil_to(x, m):
    return ((x + m - 1) // m) * m


def _prep_params(params):
    """Flatten (W, b) pairs: fuse fc41/fc42, zero-pad degenerate K dims to 8,
    cast weights to bf16 (MXU-native), biases to (1, N) f32."""
    (w1, b1), (w2, b2), (w3, b3), (w41, b41), (w42, b42), \
        (w5, b5), (w6, b6), (w7, b7), (w8, b8) = params

    bf16, f32 = jnp.bfloat16, jnp.float32

    w4 = jnp.concatenate([w41, w42], axis=1)                 # (512, 4)
    b4 = jnp.concatenate([b41, b42], axis=0)                 # (4,)

    # Zero-pad contraction dims so fc1 / fc5 run on the MXU (zero rows add 0).
    w1p = jnp.zeros((8, 128), f32).at[0:3, :].set(w1)
    w5p = jnp.zeros((8, 512), f32).at[0:2, :].set(w5)

    def b2d(b):  # biases as (1, N) f32 so they broadcast on the lane axis
        return b.reshape(1, -1).astype(f32)

    return [
        w1p.astype(bf16), b2d(b1),
        w2.astype(bf16),  b2d(b2),
        w3.astype(bf16),  b2d(b3),
        w4.astype(bf16),  b2d(b4),     # fused mu|logvar head
        w5p.astype(bf16), b2d(b5),
        w6.astype(bf16),  b2d(b6),
        w7.astype(bf16),  b2d(b7),
        w8.astype(bf16),  b2d(b8),
    ]


def vae_forward(x, eps, params, *, tb=1024):
    """x: (B, 3) f32, eps: (B, 2) f32, params: list of 9 (W, b) tuples.

    Returns (recon, mu, logvar), all f32.
    """
    B = x.shape[0]
    f32 = jnp.float32

    # Batch tile: multiple of 8 (sublane). Default 1024 amortizes the ~0.35 us
    # per-step pipeline overhead and fills the MXU M dim; capped at 2048 so the
    # bf16 activation live-set stays far below v7x's 64 MiB VMEM.
    tb = max(8, min(tb, 2048))
    tb = min(tb, _ceil_to(B, 8))
    tb = _ceil_to(tb, 8)
    # Prefer >=2 grid steps so the "parallel" batch axis can shard across the
    # two v7x TensorCores (no-op on single-core chips).
    if _ceil_to(B, tb) // tb < 2 and B >= 16:
        tb = _ceil_to((B + 1) // 2, 8)
    B_pad = _ceil_to(B, tb)

    # Pack x and eps into one lane-contiguous (B_pad, 8) slab:
    # cols 0:3 = x, 3:5 = eps, 5:8 = 0 (those columns hit zero rows of w1).
    xin = jnp.concatenate(
        [x.astype(f32), eps.astype(f32), jnp.zeros((B, 3), f32)], axis=1)
    if B_pad != B:
        xin = jnp.pad(xin, ((0, B_pad - B), (0, 0)))

    flat_params = _prep_params(params)

    grid = (B_pad // tb,)
    in_specs = [pl.BlockSpec((tb, 8), lambda i: (i, 0))]      # packed x|eps
    # Weights/biases: constant index_map -> VMEM-resident across grid steps.
    for p in flat_params:
        in_specs.append(pl.BlockSpec(p.shape, lambda i: (0, 0)))

    out = pl.pallas_call(
        vae_forward_kernel,
        out_shape=jax.ShapeDtypeStruct((B_pad, 7), f32),      # [recon|mu|logvar]
        grid=grid,
        in_specs=in_specs,
        out_specs=pl.BlockSpec((tb, 7), lambda i: (i, 0)),
        compiler_params=pltpu.CompilerParams(
            dimension_semantics=("parallel",),                # megacore on v7x
            vmem_limit_bytes=48 * 1024 * 1024,
        ),
    )(xin, *flat_params)

    return out[:B, 0:3], out[:B, 3:5], out[:B, 5:7]


# --------------------------- parameter creation -------------------------------
def init_params(key):
    """Deterministic init mimicking the Linear shapes of the PyTorch VAE."""
    sizes = [
        (3, 128),    # fc1
        (128, 256),  # fc2
        (256, 512),  # fc3
        (512, 2),    # fc41 (mu)
        (512, 2),    # fc42 (logvar)
        (2, 512),    # fc5
        (512, 256),  # fc6
        (256, 128),  # fc7
        (128, 3),    # fc8
    ]
    params = []
    for (fan_in, fan_out) in sizes:
        key, kw, kb = jax.random.split(key, 3)
        bound = 1.0 / jnp.sqrt(fan_in)                        # PyTorch default bound
        w = jax.random.uniform(kw, (fan_in, fan_out), jnp.float32, -bound, bound)
        b = jax.random.uniform(kb, (fan_out,), jnp.float32, -bound, bound)
        params.append((w, b))
    return params


# -------------------------------- reference ----------------------------------
def vae_forward_ref(x, eps, params):
    """Pure-JAX reference mirroring the kernel's bf16 matmul quantization
    (bf16 matmul inputs, f32 accumulation) so it compares at tight tolerance."""
    (w1, b1), (w2, b2), (w3, b3), (w41, b41), (w42, b42), \
        (w5, b5), (w6, b6), (w7, b7), (w8, b8) = params

    def q(a):  # bf16 round-trip (what the MXU sees)
        return a.astype(jnp.bfloat16).astype(jnp.float32)

    def mm(h, w, b):
        return q(h) @ q(w) + b

    h = jax.nn.relu(mm(x, w1, b1))
    h = jax.nn.relu(mm(h, w2, b2))
    h = jax.nn.relu(mm(h, w3, b3))
    mu = mm(h, w41, b41)
    logvar = mm(h, w42, b42)
    z = eps * jnp.exp(0.5 * logvar) + mu
    d = jax.nn.relu(mm(z, w5, b5))
    d = jax.nn.relu(mm(d, w6, b6))
    d = jax.nn.relu(mm(d, w7, b7))
    recon = jax.nn.sigmoid(mm(d, w8, b8))
    return recon, mu, logvar


if __name__ == "__main__":
    key = jax.random.PRNGKey(0)
    kx, keps, kparams = jax.random.split(key, 3)

    B = 64
    x = jax.random.normal(kx, (B, 3), jnp.float32)
    eps = jax.random.normal(keps, (B, 2), jnp.float32)   # N(0,1), as in torch .normal_()
    params = init_params(kparams)

    # Small batch -> wrapper picks tb=32 (grid of 2 batch tiles).
    recon, mu, logvar = vae_forward(x, eps, params)
    jax.block_until_ready((recon, mu, logvar))

    # sanity check against pure-JAX reference (bf16-matched, so tight tolerance)
    r_ref, mu_ref, lv_ref = vae_forward_ref(x, eps, params)
    assert jnp.allclose(recon, r_ref, atol=2e-2, rtol=2e-2), "recon mismatch"
    assert jnp.allclose(mu, mu_ref, atol=2e-2, rtol=2e-2), "mu mismatch"
    assert jnp.allclose(logvar, lv_ref, atol=2e-2, rtol=2e-2), "logvar mismatch"
    assert float(jnp.max(recon)) <= 1.0 and float(jnp.min(recon)) >= 0.0

    print("KERNEL_OK")
</pallas_src>

<mosaic_0001>
module attributes {stable_mosaic.version = 11 : i64} {
  func.func @vae_forward_kernel(%arg0: i32, %arg1: memref<32x8xf32, #tpu.memory_space<vmem>>, %arg2: memref<8x128xbf16, #tpu.memory_space<vmem>>, %arg3: memref<1x128xf32, #tpu.memory_space<vmem>>, %arg4: memref<128x256xbf16, #tpu.memory_space<vmem>>, %arg5: memref<1x256xf32, #tpu.memory_space<vmem>>, %arg6: memref<256x512xbf16, #tpu.memory_space<vmem>>, %arg7: memref<1x512xf32, #tpu.memory_space<vmem>>, %arg8: memref<512x4xbf16, #tpu.memory_space<vmem>>, %arg9: memref<1x4xf32, #tpu.memory_space<vmem>>, %arg10: memref<8x512xbf16, #tpu.memory_space<vmem>>, %arg11: memref<1x512xf32, #tpu.memory_space<vmem>>, %arg12: memref<512x256xbf16, #tpu.memory_space<vmem>>, %arg13: memref<1x256xf32, #tpu.memory_space<vmem>>, %arg14: memref<256x128xbf16, #tpu.memory_space<vmem>>, %arg15: memref<1x128xf32, #tpu.memory_space<vmem>>, %arg16: memref<128x3xbf16, #tpu.memory_space<vmem>>, %arg17: memref<1x3xf32, #tpu.memory_space<vmem>>, %arg18: memref<32x7xf32, #tpu.memory_space<vmem>>) attributes {dimension_semantics = [#tpu.dimension_semantics<parallel>], iteration_bounds = array<i64: 2>, scalar_prefetch = 0 : i64, scratch_operands = 0 : i64, tpu.core_type = #tpu.core_type<tc>, window_params = [{transform_indices = @transform_0, window_bounds = array<i64: 32, 8>}, {pipeline_mode = #tpu.pipeline_mode<synchronous>, transform_indices = @transform_1, window_bounds = array<i64: 8, 128>}, {pipeline_mode = #tpu.pipeline_mode<synchronous>, transform_indices = @transform_2, window_bounds = array<i64: 1, 128>}, {pipeline_mode = #tpu.pipeline_mode<synchronous>, transform_indices = @transform_3, window_bounds = array<i64: 128, 256>}, {pipeline_mode = #tpu.pipeline_mode<synchronous>, transform_indices = @transform_4, window_bounds = array<i64: 1, 256>}, {pipeline_mode = #tpu.pipeline_mode<synchronous>, transform_indices = @transform_5, window_bounds = array<i64: 256, 512>}, {pipeline_mode = #tpu.pipeline_mode<synchronous>, transform_indices = @transform_6, window_bounds = array<i64: 1, 512>}, {pipeline_mode = #tpu.pipeline_mode<synchronous>, transform_indices = @transform_7, window_bounds = array<i64: 512, 4>}, {pipeline_mode = #tpu.pipeline_mode<synchronous>, transform_indices = @transform_8, window_bounds = array<i64: 1, 4>}, {pipeline_mode = #tpu.pipeline_mode<synchronous>, transform_indices = @transform_9, window_bounds = array<i64: 8, 512>}, {pipeline_mode = #tpu.pipeline_mode<synchronous>, transform_indices = @transform_10, window_bounds = array<i64: 1, 512>}, {pipeline_mode = #tpu.pipeline_mode<synchronous>, transform_indices = @transform_11, window_bounds = array<i64: 512, 256>}, {pipeline_mode = #tpu.pipeline_mode<synchronous>, transform_indices = @transform_12, window_bounds = array<i64: 1, 256>}, {pipeline_mode = #tpu.pipeline_mode<synchronous>, transform_indices = @transform_13, window_bounds = array<i64: 256, 128>}, {pipeline_mode = #tpu.pipeline_mode<synchronous>, transform_indices = @transform_14, window_bounds = array<i64: 1, 128>}, {pipeline_mode = #tpu.pipeline_mode<synchronous>, transform_indices = @transform_15, window_bounds = array<i64: 128, 3>}, {pipeline_mode = #tpu.pipeline_mode<synchronous>, transform_indices = @transform_16, window_bounds = array<i64: 1, 3>}, {transform_indices = @transform_17, window_bounds = array<i64: 32, 7>}]} {
    %c0 = arith.constant 0 : index
    %c0_0 = arith.constant 0 : index
    %0 = vector.load %arg1[%c0, %c0_0] : memref<32x8xf32, #tpu.memory_space<vmem>>, vector<32x8xf32>
    %1 = vector.extract_strided_slice %0 {offsets = [0, 3], sizes = [32, 2], strides = [1, 1]} : vector<32x8xf32> to vector<32x2xf32>
    %2 = arith.truncf %0 : vector<32x8xf32> to vector<32x8xbf16>
    %c0_1 = arith.constant 0 : index
    %c0_2 = arith.constant 0 : index
    %3 = vector.load %arg2[%c0_1, %c0_2] : memref<8x128xbf16, #tpu.memory_space<vmem>>, vector<8x128xbf16>
    %cst = arith.constant dense<0.000000e+00> : vector<32x128xf32>
    %4 = tpu.matmul %2, %3, %cst {dimension_numbers = #tpu.dot_dimension_numbers<[1], [0], [0], [1], [0, 0, 1, 1], [], []>} : vector<32x8xbf16>, vector<8x128xbf16>, vector<32x128xf32> -> vector<32x128xf32>
    %c0_3 = arith.constant 0 : index
    %c0_4 = arith.constant 0 : index
    %5 = vector.load %arg3[%c0_3, %c0_4] : memref<1x128xf32, #tpu.memory_space<vmem>>, vector<1x128xf32>
    %6 = vector.broadcast %5 : vector<1x128xf32> to vector<32x128xf32>
    %7 = arith.addf %4, %6 : vector<32x128xf32>
    %cst_5 = arith.constant 0.000000e+00 : f32
    %8 = vector.broadcast %cst_5 : f32 to vector<32x128xf32>
    %9 = arith.maximumf %7, %8 : vector<32x128xf32>
    %10 = arith.truncf %9 : vector<32x128xf32> to vector<32x128xbf16>
    %c0_6 = arith.constant 0 : index
    %c0_7 = arith.constant 0 : index
    %11 = vector.load %arg4[%c0_6, %c0_7] : memref<128x256xbf16, #tpu.memory_space<vmem>>, vector<128x256xbf16>
    %cst_8 = arith.constant dense<0.000000e+00> : vector<32x256xf32>
    %12 = tpu.matmul %10, %11, %cst_8 {dimension_numbers = #tpu.dot_dimension_numbers<[1], [0], [0], [1], [0, 0, 1, 1], [], []>} : vector<32x128xbf16>, vector<128x256xbf16>, vector<32x256xf32> -> vector<32x256xf32>
    %c0_9 = arith.constant 0 : index
    %c0_10 = arith.constant 0 : index
    %13 = vector.load %arg5[%c0_9, %c0_10] : memref<1x256xf32, #tpu.memory_space<vmem>>, vector<1x256xf32>
    %14 = vector.broadcast %13 : vector<1x256xf32> to vector<32x256xf32>
    %15 = arith.addf %12, %14 : vector<32x256xf32>
    %cst_11 = arith.constant 0.000000e+00 : f32
    %16 = vector.broadcast %cst_11 : f32 to vector<32x256xf32>
    %17 = arith.maximumf %15, %16 : vector<32x256xf32>
    %18 = arith.truncf %17 : vector<32x256xf32> to vector<32x256xbf16>
    %c0_12 = arith.constant 0 : index
    %c0_13 = arith.constant 0 : index
    %19 = vector.load %arg6[%c0_12, %c0_13] : memref<256x512xbf16, #tpu.memory_space<vmem>>, vector<256x512xbf16>
    %cst_14 = arith.constant dense<0.000000e+00> : vector<32x512xf32>
    %20 = tpu.matmul %18, %19, %cst_14 {dimension_numbers = #tpu.dot_dimension_numbers<[1], [0], [0], [1], [0, 0, 1, 1], [], []>} : vector<32x256xbf16>, vector<256x512xbf16>, vector<32x512xf32> -> vector<32x512xf32>
    %c0_15 = arith.constant 0 : index
    %c0_16 = arith.constant 0 : index
    %21 = vector.load %arg7[%c0_15, %c0_16] : memref<1x512xf32, #tpu.memory_space<vmem>>, vector<1x512xf32>
    %22 = vector.broadcast %21 : vector<1x512xf32> to vector<32x512xf32>
    %23 = arith.addf %20, %22 : vector<32x512xf32>
    %cst_17 = arith.constant 0.000000e+00 : f32
    %24 = vector.broadcast %cst_17 : f32 to vector<32x512xf32>
    %25 = arith.maximumf %23, %24 : vector<32x512xf32>
    %26 = arith.truncf %25 : vector<32x512xf32> to vector<32x512xbf16>
    %c0_18 = arith.constant 0 : index
    %c0_19 = arith.constant 0 : index
    %27 = vector.load %arg8[%c0_18, %c0_19] : memref<512x4xbf16, #tpu.memory_space<vmem>>, vector<512x4xbf16>
    %cst_20 = arith.constant dense<0.000000e+00> : vector<32x4xf32>
    %28 = tpu.matmul %26, %27, %cst_20 {dimension_numbers = #tpu.dot_dimension_numbers<[1], [0], [0], [1], [0, 0, 1, 1], [], []>} : vector<32x512xbf16>, vector<512x4xbf16>, vector<32x4xf32> -> vector<32x4xf32>
    %c0_21 = arith.constant 0 : index
    %c0_22 = arith.constant 0 : index
    %29 = vector.load %arg9[%c0_21, %c0_22] : memref<1x4xf32, #tpu.memory_space<vmem>>, vector<1x4xf32>
    %30 = vector.broadcast %29 : vector<1x4xf32> to vector<32x4xf32>
    %31 = arith.addf %28, %30 : vector<32x4xf32>
    %32 = vector.extract_strided_slice %31 {offsets = [0, 0], sizes = [32, 2], strides = [1, 1]} : vector<32x4xf32> to vector<32x2xf32>
    %33 = vector.extract_strided_slice %31 {offsets = [0, 2], sizes = [32, 2], strides = [1, 1]} : vector<32x4xf32> to vector<32x2xf32>
    %cst_23 = arith.constant 5.000000e-01 : f32
    %34 = vector.broadcast %cst_23 : f32 to vector<32x2xf32>
    %35 = arith.mulf %34, %33 : vector<32x2xf32>
    %36 = math.exp %35 : vector<32x2xf32>
    %37 = arith.mulf %1, %36 : vector<32x2xf32>
    %38 = arith.addf %37, %32 : vector<32x2xf32>
    %cst_24 = arith.constant 0.000000e+00 : f32
    %39 = vector.broadcast %cst_24 : f32 to vector<32x6xf32>
    %40 = tpu.concatenate %38, %39 in 1 : vector<32x2xf32>, vector<32x6xf32> -> vector<32x8xf32>
    %41 = arith.truncf %40 : vector<32x8xf32> to vector<32x8xbf16>
    %c0_25 = arith.constant 0 : index
    %c0_26 = arith.constant 0 : index
    %42 = vector.load %arg10[%c0_25, %c0_26] : memref<8x512xbf16, #tpu.memory_space<vmem>>, vector<8x512xbf16>
    %cst_27 = arith.constant dense<0.000000e+00> : vector<32x512xf32>
    %43 = tpu.matmul %41, %42, %cst_27 {dimension_numbers = #tpu.dot_dimension_numbers<[1], [0], [0], [1], [0, 0, 1, 1], [], []>} : vector<32x8xbf16>, vector<8x512xbf16>, vector<32x512xf32> -> vector<32x512xf32>
    %c0_28 = arith.constant 0 : index
    %c0_29 = arith.constant 0 : index
    %44 = vector.load %arg11[%c0_28, %c0_29] : memref<1x512xf32, #tpu.memory_space<vmem>>, vector<1x512xf32>
    %45 = vector.broadcast %44 : vector<1x512xf32> to vector<32x512xf32>
    %46 = arith.addf %43, %45 : vector<32x512xf32>
    %cst_30 = arith.constant 0.000000e+00 : f32
    %47 = vector.broadcast %cst_30 : f32 to vector<32x512xf32>
    %48 = arith.maximumf %46, %47 : vector<32x512xf32>
    %49 = arith.truncf %48 : vector<32x512xf32> to vector<32x512xbf16>
    %c0_31 = arith.constant 0 : index
    %c0_32 = arith.constant 0 : index
    %50 = vector.load %arg12[%c0_31, %c0_32] : memref<512x256xbf16, #tpu.memory_space<vmem>>, vector<512x256xbf16>
    %cst_33 = arith.constant dense<0.000000e+00> : vector<32x256xf32>
    %51 = tpu.matmul %49, %50, %cst_33 {dimension_numbers = #tpu.dot_dimension_numbers<[1], [0], [0], [1], [0, 0, 1, 1], [], []>} : vector<32x512xbf16>, vector<512x256xbf16>, vector<32x256xf32> -> vector<32x256xf32>
    %c0_34 = arith.constant 0 : index
    %c0_35 = arith.constant 0 : index
    %52 = vector.load %arg13[%c0_34, %c0_35] : memref<1x256xf32, #tpu.memory_space<vmem>>, vector<1x256xf32>
    %53 = vector.broadcast %52 : vector<1x256xf32> to vector<32x256xf32>
    %54 = arith.addf %51, %53 : vector<32x256xf32>
    %cst_36 = arith.constant 0.000000e+00 : f32
    %55 = vector.broadcast %cst_36 : f32 to vector<32x256xf32>
    %56 = arith.maximumf %54, %55 : vector<32x256xf32>
    %57 = arith.truncf %56 : vector<32x256xf32> to vector<32x256xbf16>
    %c0_37 = arith.constant 0 : index
    %c0_38 = arith.constant 0 : index
    %58 = vector.load %arg14[%c0_37, %c0_38] : memref<256x128xbf16, #tpu.memory_space<vmem>>, vector<256x128xbf16>
    %cst_39 = arith.constant dense<0.000000e+00> : vector<32x128xf32>
    %59 = tpu.matmul %57, %58, %cst_39 {dimension_numbers = #tpu.dot_dimension_numbers<[1], [0], [0], [1], [0, 0, 1, 1], [], []>} : vector<32x256xbf16>, vector<256x128xbf16>, vector<32x128xf32> -> vector<32x128xf32>
    %c0_40 = arith.constant 0 : index
    %c0_41 = arith.constant 0 : index
    %60 = vector.load %arg15[%c0_40, %c0_41] : memref<1x128xf32, #tpu.memory_space<vmem>>, vector<1x128xf32>
    %61 = vector.broadcast %60 : vector<1x128xf32> to vector<32x128xf32>
    %62 = arith.addf %59, %61 : vector<32x128xf32>
    %cst_42 = arith.constant 0.000000e+00 : f32
    %63 = vector.broadcast %cst_42 : f32 to vector<32x128xf32>
    %64 = arith.maximumf %62, %63 : vector<32x128xf32>
    %65 = arith.truncf %64 : vector<32x128xf32> to vector<32x128xbf16>
    %c0_43 = arith.constant 0 : index
    %c0_44 = arith.constant 0 : index
    %66 = vector.load %arg16[%c0_43, %c0_44] : memref<128x3xbf16, #tpu.memory_space<vmem>>, vector<128x3xbf16>
    %cst_45 = arith.constant dense<0.000000e+00> : vector<32x3xf32>
    %67 = tpu.matmul %65, %66, %cst_45 {dimension_numbers = #tpu.dot_dimension_numbers<[1], [0], [0], [1], [0, 0, 1, 1], [], []>} : vector<32x128xbf16>, vector<128x3xbf16>, vector<32x3xf32> -> vector<32x3xf32>
    %c0_46 = arith.constant 0 : index
    %c0_47 = arith.constant 0 : index
    %68 = vector.load %arg17[%c0_46, %c0_47] : memref<1x3xf32, #tpu.memory_space<vmem>>, vector<1x3xf32>
    %69 = vector.broadcast %68 : vector<1x3xf32> to vector<32x3xf32>
    %70 = arith.addf %67, %69 : vector<32x3xf32>
    %cst_48 = arith.constant 0.000000e+00 : f32
    %71 = vector.broadcast %cst_48 : f32 to vector<32x3xf32>
    %72 = arith.subf %71, %70 : vector<32x3xf32>
    %73 = math.exp %72 : vector<32x3xf32>
    %cst_49 = arith.constant 1.000000e+00 : f32
    %74 = vector.broadcast %cst_49 : f32 to vector<32x3xf32>
    %75 = arith.addf %74, %73 : vector<32x3xf32>
    %cst_50 = arith.constant 1.000000e+00 : f32
    %76 = vector.broadcast %cst_50 : f32 to vector<32x3xf32>
    %77 = arith.divf %76, %75 : vector<32x3xf32>
    %78 = tpu.concatenate %77, %31 in 1 : vector<32x3xf32>, vector<32x4xf32> -> vector<32x7xf32>
    %c0_51 = arith.constant 0 : index
    %c0_52 = arith.constant 0 : index
    %79 = vector.load %arg18[%c0_51, %c0_52] : memref<32x7xf32, #tpu.memory_space<vmem>>, vector<32x7xf32>
    tpu.vector_store %arg18[%c0_51, %c0_52], %78 {strides = array<i32>} : memref<32x7xf32, #tpu.memory_space<vmem>>, vector<32x7xf32>,
    return
  }
  func.func @transform_0(%arg0: i32) -> (i32, i32) {
    %c0_i32 = arith.constant 0 : i32
    %c0_i32_0 = arith.constant 0 : i32
    return %arg0, %c0_i32 : i32, i32
  }
  func.func @transform_1(%arg0: i32) -> (i32, i32) {
    %c0_i32 = arith.constant 0 : i32
    %c0_i32_0 = arith.constant 0 : i32
    %c0_i32_1 = arith.constant 0 : i32
    return %c0_i32, %c0_i32_0 : i32, i32
  }
  func.func @transform_2(%arg0: i32) -> (i32, i32) {
    %c0_i32 = arith.constant 0 : i32
    %c0_i32_0 = arith.constant 0 : i32
    %c0_i32_1 = arith.constant 0 : i32
    return %c0_i32, %c0_i32_0 : i32, i32
  }
  func.func @transform_3(%arg0: i32) -> (i32, i32) {
    %c0_i32 = arith.constant 0 : i32
    %c0_i32_0 = arith.constant 0 : i32
    %c0_i32_1 = arith.constant 0 : i32
    return %c0_i32, %c0_i32_0 : i32, i32
  }
  func.func @transform_4(%arg0: i32) -> (i32, i32) {
    %c0_i32 = arith.constant 0 : i32
    %c0_i32_0 = arith.constant 0 : i32
    %c0_i32_1 = arith.constant 0 : i32
    return %c0_i32, %c0_i32_0 : i32, i32
  }
  func.func @transform_5(%arg0: i32) -> (i32, i32) {
    %c0_i32 = arith.constant 0 : i32
    %c0_i32_0 = arith.constant 0 : i32
    %c0_i32_1 = arith.constant 0 : i32
    return %c0_i32, %c0_i32_0 : i32, i32
  }
  func.func @transform_6(%arg0: i32) -> (i32, i32) {
    %c0_i32 = arith.constant 0 : i32
    %c0_i32_0 = arith.constant 0 : i32
    %c0_i32_1 = arith.constant 0 : i32
    return %c0_i32, %c0_i32_0 : i32, i32
  }
  func.func @transform_7(%arg0: i32) -> (i32, i32) {
    %c0_i32 = arith.constant 0 : i32
    %c0_i32_0 = arith.constant 0 : i32
    %c0_i32_1 = arith.constant 0 : i32
    return %c0_i32, %c0_i32_0 : i32, i32
  }
  func.func @transform_8(%arg0: i32) -> (i32, i32) {
    %c0_i32 = arith.constant 0 : i32
    %c0_i32_0 = arith.constant 0 : i32
    %c0_i32_1 = arith.constant 0 : i32
    return %c0_i32, %c0_i32_0 : i32, i32
  }
  func.func @transform_9(%arg0: i32) -> (i32, i32) {
    %c0_i32 = arith.constant 0 : i32
    %c0_i32_0 = arith.constant 0 : i32
    %c0_i32_1 = arith.constant 0 : i32
    return %c0_i32, %c0_i32_0 : i32, i32
  }
  func.func @transform_10(%arg0: i32) -> (i32, i32) {
    %c0_i32 = arith.constant 0 : i32
    %c0_i32_0 = arith.constant 0 : i32
    %c0_i32_1 = arith.constant 0 : i32
    return %c0_i32, %c0_i32_0 : i32, i32
  }
  func.func @transform_11(%arg0: i32) -> (i32, i32) {
    %c0_i32 = arith.constant 0 : i32
    %c0_i32_0 = arith.constant 0 : i32
    %c0_i32_1 = arith.constant 0 : i32
    return %c0_i32, %c0_i32_0 : i32, i32
  }
  func.func @transform_12(%arg0: i32) -> (i32, i32) {
    %c0_i32 = arith.constant 0 : i32
    %c0_i32_0 = arith.constant 0 : i32
    %c0_i32_1 = arith.constant 0 : i32
    return %c0_i32, %c0_i32_0 : i32, i32
  }
  func.func @transform_13(%arg0: i32) -> (i32, i32) {
    %c0_i32 = arith.constant 0 : i32
    %c0_i32_0 = arith.constant 0 : i32
    %c0_i32_1 = arith.constant 0 : i32
    return %c0_i32, %c0_i32_0 : i32, i32
  }
  func.func @transform_14(%arg0: i32) -> (i32, i32) {
    %c0_i32 = arith.constant 0 : i32
    %c0_i32_0 = arith.constant 0 : i32
    %c0_i32_1 = arith.constant 0 : i32
    return %c0_i32, %c0_i32_0 : i32, i32
  }
  func.func @transform_15(%arg0: i32) -> (i32, i32) {
    %c0_i32 = arith.constant 0 : i32
    %c0_i32_0 = arith.constant 0 : i32
    %c0_i32_1 = arith.constant 0 : i32
    return %c0_i32, %c0_i32_0 : i32, i32
  }
  func.func @transform_16(%arg0: i32) -> (i32, i32) {
    %c0_i32 = arith.constant 0 : i32
    %c0_i32_0 = arith.constant 0 : i32
    %c0_i32_1 = arith.constant 0 : i32
    return %c0_i32, %c0_i32_0 : i32, i32
  }
  func.func @transform_17(%arg0: i32) -> (i32, i32) {
    %c0_i32 = arith.constant 0 : i32
    %c0_i32_0 = arith.constant 0 : i32
    return %arg0, %c0_i32 : i32, i32
  }
}

</mosaic_0001>

<bundles_post_ra>
// kernel: tpu_custom_call.1
= control target key start
LH: loop header
LB: loop body
LE: loop exit
PB: predicated region body
PF: predicated region fallthrough
CT: control target
= control target key end

     0   :  { %s4638_s0 = inlined_call_operand.vmem [shape: f32[64,8], index: 0, kind: input, shape index: {}]   ;;  %s4639_s1 = inlined_call_operand.vmem [shape: bf16[8,128], index: 1, kind: input, shape index: {}]   ;;  %s4640_s2 = inlined_call_operand.vmem [shape: f32[1,128], index: 2, kind: input, shape index: {}]   ;;  %s4641_s3 = inlined_call_operand.vmem [shape: bf16[128,256], index: 3, kind: input, shape index: {}]   ;;  %s4642_s4 = inlined_call_operand.vmem [shape: f32[1,256], index: 4, kind: input, shape index: {}]   ;;  %s4643_s5 = inlined_call_operand.hbm [shape: bf16[256,512], index: 5, kind: input, shape index: {}]   ;;  %s4644_s6 = inlined_call_operand.vmem [shape: f32[1,512], index: 6, kind: input, shape index: {}]   ;;  %s4645_s7 = inlined_call_operand.vmem [shape: bf16[512,4], index: 7, kind: input, shape index: {}]   ;;  %s4646_s8 = inlined_call_operand.vmem [shape: f32[1,4], index: 8, kind: input, shape index: {}]   ;;  %s4647_s9 = inlined_call_operand.vmem [shape: bf16[8,512], index: 9, kind: input, shape index: {}]   ;;  %s4648_s10 = inlined_call_operand.vmem [shape: f32[1,512], index: 10, kind: input, shape index: {}]   ;;  %s4649_s11 = inlined_call_operand.hbm [shape: bf16[512,256], index: 11, kind: input, shape index: {}]   ;;  %s4650_s12 = inlined_call_operand.vmem [shape: f32[1,256], index: 12, kind: input, shape index: {}]   ;;  %s4651_s13 = inlined_call_operand.vmem [shape: bf16[256,128], index: 13, kind: input, shape index: {}]   ;;  %s4652_s14 = inlined_call_operand.vmem [shape: f32[1,128], index: 14, kind: input, shape index: {}]   ;;  %s4653_s15 = inlined_call_operand.vmem [shape: bf16[128,3], index: 15, kind: input, shape index: {}]   ;;  %s4654_s16 = inlined_call_operand.vmem [shape: f32[1,3], index: 16, kind: input, shape index: {}]   ;;  %s4655_s17 = inlined_call_operand.vmem [shape: f32[64,7], index: 17, kind: output, shape index: {}]  }
   0x1   :  { %4656 = sst [smem:[#allocation8_spill]] %s4638_s0 }
   0x2   :  { %4657 = sst [smem:[#allocation9_spill]] %s4639_s1 }
   0x3   :  { %4658 = sst [smem:[#allocation10_spill]] %s4643_s5 }
   0x4   :  { %22 = vsyncpa [#allocation3], 0 }
   0x5   :  { %23 = vsyncpa [#allocation5], 0  ;;  %s4174_s24 = smov 0  }
   0x6 LB: > { %s4659_s5 = sld [smem:[#allocation10_spill]]  ;;  %s2888_s28 = sadd.s32 4294967295, %s4073_s24   ;;  %s4073_s24 = sphi %s4174_s24, %s29_s24  }
   0x7   : > { %p2890_p0 = scmp.ge.s32.totalorder %s4073_s24, 1  ;;  %p422_p1 = scmp.lt.s32.totalorder %s4073_s24, 3 }
   0x8   : > { %p4185_p2 = scmp.eq.s32.totalorder %s2888_s28, 0  ;;  %s4075_s30 = smov [#allocation2]  }
   0x9   : > { %p4189_p3 = pnand %p2890_p0, %p422_p1  ;;  %s447_s18 = sshll.u32 %s4075_s30, 4  ;;  %s448_s18 = int_to_ptr.vmem [resolvable:$true] %s447_s18 }
   0xa   : > { %s474_s20 = sshll.u32 %s4649_s11, 4  ;;  %s4076_s21 = smov [#allocation4]   ;;  %s475_s20 = int_to_ptr.hbm [resolvable:$true] %s474_s20 }
   0xb   : > { %p3929_p4 = pneg %p4189_p3  ;;  %s476_s22 = sshll.u32 %s4076_s21, 4  ;;  %s477_s22 = int_to_ptr.vmem [resolvable:$true] %s476_s22 }
   0xc   : > { %s445_s27 = sshll.u32 %s4659_s5, 4  ;;  %s4077_s23 = smov 256   ;;  %s446_s27 = int_to_ptr.hbm [resolvable:$true] %s445_s27 }
   0xd   : > { %p3930_p5 = pnand %p4185_p2, %p3929_p4  ;;  %s4078_s25 = smov 16  }
   0xe   : > { %s4079_s26 = smov 128   ;;  %s4080_s5 = smov 8  }
   0xf   : > { %3932 = dma.hbm_to_vmem [thread:$0]  (!%p3930_p5), %s446_s27, 8192, %s448_s18, [#allocation3], %s4077_s23, %s4077_s23, %s4078_s25  }
  0x10   : > { %3935 = dma.hbm_to_vmem [thread:$0]  (!%p3930_p5), %s475_s20, 8192, %s477_s22, [#allocation5], %s4079_s26, %s4079_s26, %s4080_s5  }
  0x11   : > { %516 = sbr.rel (%p4189_p3) target bundleno = 1545 (0x609), region = 88 }
  0x16   : > { %4064 = dma.done.wait (%p4185_p2), [#allocation3], 8192  }
  0x17   : > { %4066 = vsyncadd (%p4185_p2), [#allocation3], 4294959104 }
  0x18   : > { %4068 = dma.done.wait (%p4185_p2), [#allocation5], 8192  }
  0x19   : > { %4070 = vsyncadd (%p4185_p2), [#allocation5], 4294959104  ;;  %s2897_s30 = sshll.u32 %s2888_s28, 2  ;;  %vm605_vm0 = vcmask 1043456   ;;  %s4662_s18 = sld [smem:[#allocation8_spill]]  ;;  %vm598_vm1 = vcmask 64512  }
  0x1a   : > { %p575_p6 = scmp.lt.s32.totalorder %s2897_s30, 7  ;;  %s4663_s21 = sld [smem:[#allocation9_spill]]  ;;  %v2961_v5 = vld [vmem:[%s4641_s3 + $0x70] sm:$0xf]  ;;  %v3728_v6 = vld [vmem:[%s4641_s3 + $0x74] sm:$0xf0] }
  0x1b   : > { %v3727_v7 = vld [vmem:[%s4641_s3 + $0x74] sm:$0xf]  ;;  %v2963_v8 = vld [vmem:[%s4641_s3 + $0x78] sm:$0xf0]  ;;  %v2962_v9 = vor.u32 %v3728_v6, %v2961_v5  ;;  %v2953_v11 = vld [vmem:[%s4641_s3 + $0x60] sm:$0xf] }
  0x1c   : > { %s4665_s30 = smov (!%p575_p6, %s2897_s30), 7  ;;  %v2966_v10 = vor.u32 %v3727_v7, %v2963_v8  ;;  %v3726_v12 = vld [vmem:[%s4641_s3 + $0x64] sm:$0xf0]  ;;  %v3725_v13 = vld [vmem:[%s4641_s3 + $0x64] sm:$0xf]  ;;  %s4081_s25 = smov 3  }
  0x1d   : > { %s2898_s5 = sshll.u32 %s4665_s30, 3  ;;  %v2955_v14 = vld [vmem:[%s4641_s3 + $0x68] sm:$0xf0]  ;;  %736 = vmatpush.bf16.msra.mxu1 %v2962_v9  ;;  %v2954_v15 = vor.u32 %v3726_v12, %v2953_v11  ;;  %v2945_v17 = vld [vmem:[%s4641_s3 + $0x50] sm:$0xf]  ;;  %s4082_s26 = smov 1  }
  0x1e   : > { %755 = vmatpush.bf16.msra.mxu2 %v2966_v10  ;;  %v2958_v16 = vor.u32 %v3725_v13, %v2955_v14  ;;  %v3724_v18 = vld [vmem:[%s4641_s3 + $0x54] sm:$0xf0]  ;;  %v3723_v19 = vld [vmem:[%s4641_s3 + $0x54] sm:$0xf]  ;;  %v2947_v20 = vld [vmem:[%s4641_s3 + $0x58] sm:$0xf0] }
  0x1f   : > { %s4218_s19 = scalar_lea.vmem %s4662_s18, %s2898_s5  ;;  %v2946_v21 = vor.u32 %v3724_v18, %v2945_v17  ;;  %v2950_v22 = vor.u32 %v3723_v19, %v2947_v20  ;;  %v2937_v23 = vld [vmem:[%s4641_s3 + $0x40] sm:$0xf]  ;;  %v3722_v24 = vld [vmem:[%s4641_s3 + $0x44] sm:$0xf0]  ;;  %v3721_v25 = vld [vmem:[%s4641_s3 + $0x44] sm:$0xf] }
  0x20   : > { %v593_v0 = vld [vmem:[%s4663_s21] sm:$0xf]  ;;  %v588_v2 = vld [vmem:[%s4218_s19 + $0x8] sm:$0xff]  ;;  %v2938_v27 = vor.u32 %v3722_v24, %v2937_v23  ;;  %v589_v28 = vld [vmem:[%s4218_s19 + $0x10] sm:$0xff]  ;;  %s4083_s20 = smov 125   ;;  %vm1760_vm2 = vcmask 15360  }
  0x21   : > { %v587_v1 = vld [vmem:[%s4218_s19] sm:$0xff]  ;;  %v607_v3 = vsel %vm605_vm0, %v593_v0, 0  ;;  %737 = vmatpush.bf16.msra.mxu1 %v2954_v15  ;;  %v2939_v26 = vld [vmem:[%s4641_s3 + $0x48] sm:$0xf0]  ;;  %v590_v29 = vld [vmem:[%s4218_s19 + $0x18] sm:$0xff]  ;;  %vm2800_vm6 = vcmask 23552  }
  0x22   : > { %v591_v4 = vpack.c.bf16 %v588_v2, %v587_v1  ;;  %616 = vmatpush.bf16.msra.mxu0 %v607_v3  ;;  %756 = vmatpush.bf16.msra.mxu2 %v2958_v16  ;;  %v2942_v30 = vor.u32 %v3721_v25, %v2939_v26  ;;  %v592_v31 = vpack.c.bf16 %v590_v29, %v589_v28  ;;  %v2929_v32 = vld [vmem:[%s4641_s3 + $0x30] sm:$0xf]  ;;  %v3720_v33 = vld [vmem:[%s4641_s3 + $0x34] sm:$0xf0]  ;;  %v3719_v34 = vld [vmem:[%s4641_s3 + $0x34] sm:$0xf] }
  0x23   : > { %v2930_v35 = vor.u32 %v3720_v33, %v2929_v32  ;;  %v2931_v36 = vld [vmem:[%s4641_s3 + $0x38] sm:$0xf0]  ;;  %v2921_v38 = vld [vmem:[%s4641_s3 + $0x20] sm:$0xf]  ;;  %v3718_v39 = vld [vmem:[%s4641_s3 + $0x24] sm:$0xf0] }
  0x24   : > { %v2934_v37 = vor.u32 %v3719_v34, %v2931_v36  ;;  %v3717_v40 = vld [vmem:[%s4641_s3 + $0x24] sm:$0xf]  ;;  %v2922_v41 = vor.u32 %v3718_v39, %v2921_v38  ;;  %v2923_v42 = vld [vmem:[%s4641_s3 + $0x28] sm:$0xf0]  ;;  %v2913_v44 = vld [vmem:[%s4641_s3 + $0x10] sm:$0xf] }
  0x25   : > { %2901 = vmatmul.msk.bf16.vlgmr.msra.gmra.mxu0 %vm598_vm1, %v591_v4  ;;  %738 = vmatpush.bf16.msra.mxu1 %v2946_v21  ;;  %v2926_v43 = vor.u32 %v3717_v40, %v2923_v42  ;;  %v3716_v45 = vld [vmem:[%s4641_s3 + $0x14] sm:$0xf0]  ;;  %v3715_v46 = vld [vmem:[%s4641_s3 + $0x14] sm:$0xf]  ;;  %v2915_v48 = vld [vmem:[%s4641_s3 + $0x18] sm:$0xf0] }
  0x26   : > { %757 = vmatpush.bf16.msra.mxu2 %v2950_v22  ;;  %v2914_v47 = vor.u32 %v3716_v45, %v2913_v44  ;;  %v2918_v49 = vor.u32 %v3715_v46, %v2915_v48  ;;  %v2905_v50 = vld [vmem:[%s4641_s3] sm:$0xf]  ;;  %v3714_v51 = vld [vmem:[%s4641_s3 + $0x4] sm:$0xf0]  ;;  %v3713_v52 = vld [vmem:[%s4641_s3 + $0x4] sm:$0xf] }
  0x27   : > { %v2906_v53 = vor.u32 %v3714_v51, %v2905_v50  ;;  %v2907_v54 = vld [vmem:[%s4641_s3 + $0x8] sm:$0xf0]  ;;  %v3081_v56 = vld [vmem:[#allocation2 + $0xe0] sm:$0xf]  ;;  %v3759_v57 = vld [vmem:[#allocation2 + $0xec] sm:$0xf0] }
  0x28   : > { %v2910_v55 = vor.u32 %v3713_v52, %v2907_v54  ;;  %v3757_v58 = vld [vmem:[#allocation2 + $0xe4] sm:$0xf]  ;;  %v3082_v60 = vor.u32 %v3759_v57, %v3081_v56  ;;  %v3083_v61 = vld [vmem:[#allocation2 + $0xf0] sm:$0xf0]  ;;  %v3065_v62 = vld [vmem:[#allocation2 + $0xc0] sm:$0xf] }
  0x29   : > { %739 = vmatpush.bf16.msra.mxu1 %v2938_v27  ;;  %v3755_v63 = vld [vmem:[#allocation2 + $0xcc] sm:$0xf0]  ;;  %v3086_v0 = vor.u32 %v3757_v58, %v3083_v61  ;;  %v3753_v1 = vld [vmem:[#allocation2 + $0xc4] sm:$0xf]  ;;  %v3067_v2 = vld [vmem:[#allocation2 + $0xd0] sm:$0xf0] }
  0x2a   : > { %758 = vmatpush.bf16.msra.mxu2 %v2942_v30  ;;  %v3789_v3 = vld [vmem:[#allocation2 + $0x1e4] sm:$0xf]  ;;  %1180 = vmatpush.bf16.msra.mxu3 %v3082_v60  ;;  %v3066_v4 = vor.u32 %v3755_v63, %v3065_v62  ;;  %v3211_v5 = vld [vmem:[#allocation2 + $0x1f0] sm:$0xf0]  ;;  %v3209_v6 = vld [vmem:[#allocation2 + $0x1e0] sm:$0xf]  ;;  %v3070_v9 = vor.u32 %v3753_v1, %v3067_v2 }
  0x2b   : > { %v3791_v7 = vld [vmem:[#allocation2 + $0x1ec] sm:$0xf0]  ;;  %v3967_v8 = vld [vmem:[%s4640_s2] ss:$0 sm:$0xff]  ;;  %v3214_v10 = vor.u32 %v3789_v3, %v3211_v5  ;;  %v3749_v14 = vld [vmem:[#allocation2 + $0xa4] sm:$0xf] }
  0x2c   : > { %v3210_v11 = vor.u32 %v3791_v7, %v3209_v6  ;;  %v3049_v12 = vld [vmem:[#allocation2 + $0xa0] sm:$0xf]  ;;  %v3751_v13 = vld [vmem:[#allocation2 + $0xac] sm:$0xf0]  ;;  %v3051_v15 = vld [vmem:[#allocation2 + $0xb0] sm:$0xf0] }
  0x2d   : > { %740 = vmatpush.bf16.msra.mxu1 %v2930_v35  ;;  %v3785_v16 = vld [vmem:[#allocation2 + $0x1c4] sm:$0xf]  ;;  %v3195_v17 = vld [vmem:[#allocation2 + $0x1d0] sm:$0xf0]  ;;  %v3193_v18 = vld [vmem:[#allocation2 + $0x1c0] sm:$0xf]  ;;  %v3050_v20 = vor.u32 %v3751_v13, %v3049_v12  ;;  %v3054_v25 = vor.u32 %v3749_v14, %v3051_v15 }
  0x2e   : > { %759 = vmatpush.bf16.msra.mxu2 %v2934_v37  ;;  %1199 = vmatpush.bf16.msrb.mxu0 %v3210_v11  ;;  %v3787_v19 = vld [vmem:[#allocation2 + $0x1cc] sm:$0xf0]  ;;  %v3198_v21 = vor.u32 %v3785_v16, %v3195_v17  ;;  %v3033_v23 = vld [vmem:[#allocation2 + $0x80] sm:$0xf]  ;;  %v3781_v27 = vld [vmem:[#allocation2 + $0x1a4] sm:$0xf] }
  0x2f   : > { %1181 = vmatpush.bf16.msra.mxu3 %v3066_v4  ;;  %v3194_v22 = vor.u32 %v3787_v19, %v3193_v18  ;;  %v3747_v26 = vld [vmem:[#allocation2 + $0x8c] sm:$0xf0]  ;;  %v3179_v28 = vld [vmem:[#allocation2 + $0x1b0] sm:$0xf0]  ;;  %v3177_v30 = vld [vmem:[#allocation2 + $0x1a0] sm:$0xf] }
  0x30   : > { %v3745_v33 = vld [vmem:[#allocation2 + $0x84] sm:$0xf]  ;;  %v3035_v34 = vld [vmem:[#allocation2 + $0x90] sm:$0xf0]  ;;  %v3182_v35 = vor.u32 %v3781_v27, %v3179_v28  ;;  %v3034_v37 = vor.u32 %v3747_v26, %v3033_v23  ;;  %v3743_v50 = vld [vmem:[#allocation2 + $0x6c] sm:$0xf0] }
  0x31   : > { %741 = vmatpush.bf16.msra.mxu1 %v2922_v41  ;;  %v3038_v40 = vor.u32 %v3745_v33, %v3035_v34  ;;  %v3741_v51 = vld [vmem:[#allocation2 + $0x64] sm:$0xf]  ;;  %v3163_v56 = vld [vmem:[#allocation2 + $0x190] sm:$0xf0]  ;;  %v3161_v57 = vld [vmem:[#allocation2 + $0x180] sm:$0xf] }
  0x32   : > { %760 = vmatpush.bf16.msra.mxu2 %v2926_v43  ;;  %1200 = vmatpush.bf16.msrb.mxu0 %v3194_v22  ;;  %v3001_v61 = vld [vmem:[#allocation2 + $0x40] sm:$0xf]  ;;  %v3739_v62 = vld [vmem:[#allocation2 + $0x4c] sm:$0xf0]  ;;  %v3737_v63 = vld [vmem:[#allocation2 + $0x44] sm:$0xf] }
  0x33   : > { %1182 = vmatpush.bf16.msra.mxu3 %v3050_v20  ;;  %v3003_v1 = vld [vmem:[#allocation2 + $0x50] sm:$0xf0]  ;;  %v3773_v3 = vld [vmem:[#allocation2 + $0x164] sm:$0xf]  ;;  %v3145_v6 = vld [vmem:[#allocation2 + $0x160] sm:$0xf] }
  0x34   : > { %v3006_v2 = vor.u32 %v3737_v63, %v3003_v1  ;;  %v3147_v4 = vld [vmem:[#allocation2 + $0x170] sm:$0xf0]  ;;  %v3775_v7 = vld [vmem:[#allocation2 + $0x16c] sm:$0xf0]  ;;  %v3733_v11 = vld [vmem:[#allocation2 + $0x24] sm:$0xf] }
  0x35   : > { %2902 = vmatmul.msk.bf16.gmra.mxu0 %vm598_vm1, %v592_v31  ;;  %742 = vmatpush.bf16.msra.mxu1 %v2914_v47  ;;  %v3783_v31 = vld [vmem:[#allocation2 + $0x1ac] sm:$0xf0]  ;;  %v3150_v5 = vor.u32 %v3773_v3, %v3147_v4  ;;  %v2987_v13 = vld [vmem:[#allocation2 + $0x30] sm:$0xf0]  ;;  %v3769_v15 = vld [vmem:[#allocation2 + $0x144] sm:$0xf] }
  0x36   : > { %761 = vmatpush.bf16.msra.mxu2 %v2918_v49  ;;  %v3178_v36 = vor.u32 %v3783_v31, %v3177_v30  ;;  %v3017_v49 = vld [vmem:[#allocation2 + $0x60] sm:$0xf]  ;;  %v2990_v14 = vor.u32 %v3733_v11, %v2987_v13  ;;  %v3131_v16 = vld [vmem:[#allocation2 + $0x150] sm:$0xf0]  ;;  %v3771_v19 = vld [vmem:[#allocation2 + $0x14c] sm:$0xf0] }
  0x37   : > { %1183 = vmatpush.bf16.msra.mxu3 %v3034_v37  ;;  %v3018_v52 = vor.u32 %v3743_v50, %v3017_v49  ;;  %v3129_v17 = vld [vmem:[#allocation2 + $0x140] sm:$0xf]  ;;  %v3134_v18 = vor.u32 %v3769_v15, %v3131_v16  ;;  %v3731_v22 = vld [vmem:[#allocation2 + $0xc] sm:$0xf0]  ;;  %v3729_v23 = vld [vmem:[#allocation2 + $0x4] sm:$0xf] }
  0x38   : > { %1201 = vmatpush.bf16.msrb.mxu0 %v3178_v36  ;;  %v3130_v20 = vor.u32 %v3771_v19, %v3129_v17  ;;  %v3765_v27 = vld [vmem:[#allocation2 + $0x124] sm:$0xf]  ;;  %v3115_v28 = vld [vmem:[#allocation2 + $0x130] sm:$0xf0]  ;;  %v3767_v31 = vld [vmem:[#allocation2 + $0x12c] sm:$0xf0] }
  0x39   : > { %743 = vmatpush.bf16.msra.mxu1 %v2906_v53  ;;  %v3019_v53 = vld [vmem:[#allocation2 + $0x70] sm:$0xf0]  ;;  %v3118_v30 = vor.u32 %v3765_v27, %v3115_v28  ;;  %v3089_v33 = vld [vmem:[#allocation2 + $0xe8] sm:$0xf]  ;;  %v3760_v34 = vld [vmem:[#allocation2 + $0xf4] sm:$0xf0] }
  0x3a   : > { %762 = vmatpush.bf16.msra.mxu2 %v2910_v55  ;;  %v3022_v54 = vor.u32 %v3741_v51, %v3019_v53  ;;  %v3777_v55 = vld [vmem:[#allocation2 + $0x184] sm:$0xf]  ;;  %v3090_v36 = vor.u32 %v3760_v34, %v3089_v33  ;;  %v3091_v37 = vld [vmem:[#allocation2 + $0xf8] sm:$0xf0]  ;;  %v3790_v51 = vld [vmem:[#allocation2 + $0x1ec] sm:$0xf] }
  0x3b   : > { %1184 = vmatpush.bf16.msra.mxu3 %v3018_v52  ;;  %v3166_v58 = vor.u32 %v3777_v55, %v3163_v56  ;;  %v3075_v49 = vld [vmem:[#allocation2 + $0xd8] sm:$0xf0]  ;;  %v3217_v53 = vld [vmem:[#allocation2 + $0x1e8] sm:$0xf]  ;;  %v3792_v55 = vld [vmem:[#allocation2 + $0x1f4] sm:$0xf0] }
  0x3c   : > { %v3219_v52 = vld [vmem:[#allocation2 + $0x1f8] sm:$0xf0]  ;;  %v3218_v56 = vor.u32 %v3792_v55, %v3217_v53  ;;  %v3786_v63 = vld [vmem:[#allocation2 + $0x1cc] sm:$0xf]  ;;  %v3201_v1 = vld [vmem:[#allocation2 + $0x1c8] sm:$0xf] }
  0x3d   : > { %1218 = vmatpush.bf16.msrb.mxu1 %v3086_v0  ;;  %v3002_v0 = vor.u32 %v3739_v62, %v3001_v61  ;;  %v3059_v61 = vld [vmem:[#allocation2 + $0xb8] sm:$0xf0]  ;;  %v3788_v3 = vld [vmem:[#allocation2 + $0x1d4] sm:$0xf0]  ;;  %v3782_v11 = vld [vmem:[#allocation2 + $0x1ac] sm:$0xf] }
  0x3e   : > { %1237 = vmatpush.bf16.msrb.mxu2 %v3214_v10  ;;  %v3735_v10 = vld [vmem:[#allocation2 + $0x2c] sm:$0xf0]  ;;  %v3202_v4 = vor.u32 %v3788_v3, %v3201_v1  ;;  %v3185_v13 = vld [vmem:[#allocation2 + $0x1a8] sm:$0xf]  ;;  %v3784_v15 = vld [vmem:[#allocation2 + $0x1b4] sm:$0xf0] }
  0x3f   : > { %1185 = vmatpush.bf16.msra.mxu3 %v3002_v0  ;;  %v3203_v0 = vld [vmem:[#allocation2 + $0x1d8] sm:$0xf0]  ;;  %v3186_v16 = vor.u32 %v3784_v15, %v3185_v13  ;;  %v3025_v17 = vld [vmem:[#allocation2 + $0x68] sm:$0xf]  ;;  %v3742_v19 = vld [vmem:[#allocation2 + $0x6c] sm:$0xf] }
  0x40   : > { %v3738_v33 = vld [vmem:[#allocation2 + $0x4c] sm:$0xf]  ;;  %v3137_v55 = vld [vmem:[#allocation2 + $0x148] sm:$0xf]  ;;  %vm2805_vm7 = vcmask 56320  }
  0x41   : > { %1219 = vmatpush.bf16.msrb.mxu1 %v3070_v9  ;;  %v2985_v9 = vld [vmem:[#allocation2 + $0x20] sm:$0xf]  ;;  %v3766_v3 = vld [vmem:[#allocation2 + $0x12c] sm:$0xf] }
  0x42   : > { %1238 = vmatpush.bf16.msrb.mxu2 %v3198_v21  ;;  %v2986_v12 = vor.u32 %v3735_v10, %v2985_v9  ;;  %v2969_v21 = vld [vmem:[#allocation2] sm:$0xf]  ;;  %v3043_v9 = vld [vmem:[#allocation2 + $0x98] sm:$0xf0]  ;;  %v3762_v15 = vld [vmem:[#allocation2 + $0x10c] sm:$0xf] }
  0x44   : > { %1186 = vmatpush.bf16.msra.mxu3 %v2986_v12  ;;  %v3187_v12 = vld [vmem:[#allocation2 + $0x1b8] sm:$0xf0] }
  0x45   : > { %1220 = vmatpush.bf16.msrb.mxu1 %v3054_v25  ;;  %v2971_v25 = vld [vmem:[#allocation2 + $0x10] sm:$0xf0] }
  0x46   : > { %1239 = vmatpush.bf16.msrb.mxu2 %v3182_v35  ;;  %v2974_v26 = vor.u32 %v3729_v23, %v2971_v25  ;;  %v3758_v35 = vld [vmem:[#allocation2 + $0xec] sm:$0xf]  ;;  %v3169_v25 = vld [vmem:[#allocation2 + $0x188] sm:$0xf] }
  0x47   : > { %v3778_v23 = vld [vmem:[#allocation2 + $0x18c] sm:$0xf] }
  0x49   : > { %1221 = vmatpush.bf16.msrb.mxu1 %v3038_v40  ;;  %v3099_v40 = vld [vmem:[#allocation2 + $0x110] sm:$0xf0] }
  0x4a   : > { %1240 = vmatpush.bf16.msrb.mxu2 %v3166_v58  ;;  %v3752_v58 = vld [vmem:[#allocation2 + $0xb4] sm:$0xf0] }
  0x4d   : > { %1222 = vmatpush.bf16.msrb.mxu1 %v3022_v54  ;;  %v3222_v54 = vor.u32 %v3790_v51, %v3219_v52  ;;  %v3139_v51 = vld [vmem:[#allocation2 + $0x158] sm:$0xf0] }
  0x4e   : > { %1241 = vmatpush.bf16.msrb.mxu2 %v3150_v5  ;;  %v3041_v5 = vld [vmem:[#allocation2 + $0x88] sm:$0xf] }
  0x51   : > { %1223 = vmatpush.bf16.msrb.mxu1 %v3006_v2  ;;  %v3206_v2 = vor.u32 %v3786_v63, %v3203_v0 }
  0x52   : > { %1242 = vmatpush.bf16.msrb.mxu2 %v3134_v18  ;;  %v3744_v18 = vld [vmem:[#allocation2 + $0x74] sm:$0xf0] }
  0x55   : > { %1224 = vmatpush.bf16.msrb.mxu1 %v2990_v14  ;;  %v3190_v14 = vor.u32 %v3782_v11, %v3187_v12 }
  0x56   : > { %1243 = vmatpush.bf16.msrb.mxu2 %v3118_v30 }
  0x59   : > { %1225 = vmatpush.bf16.msrb.mxu1 %v2974_v26  ;;  %v650_v26 = vld [vmem:[%s4642_s4] sm:$0x3] }
  0x5a   : > { %v653_v63 = vperm.slane %v650_v26, 1 }
  0xa2   : > { %v618_v59 = vpop.f32.mrf.mxu0 }
  0xa3   : > { %v619_v24 = vadd.f32 %v3967_v8, %v618_v59  ;;  %v3779_v59 = vld [vmem:[#allocation2 + $0x18c] sm:$0xf0] }
  0xa4   : > { %v3162_v60 = vor.u32 %v3779_v59, %v3161_v57  ;;  %v3057_v57 = vld [vmem:[#allocation2 + $0xa8] sm:$0xf]  ;;  %v3750_v59 = vld [vmem:[#allocation2 + $0xac] sm:$0xf] }
  0xa5   : > { %v628_v38 = vmax.f32 %v619_v24, 0.0  ;;  %v2970_v24 = vor.u32 %v3731_v22, %v2969_v21  ;;  %v3062_v62 = vor.u32 %v3750_v59, %v3059_v61  ;;  %v3027_v21 = vld [vmem:[#allocation2 + $0x78] sm:$0xf0]  ;;  %v3730_v61 = vld [vmem:[#allocation2 + $0xc] sm:$0xf] }
  0xa6   : > { %1202 = vmatpush.bf16.msrb.mxu0 %v3162_v60  ;;  %v3058_v60 = vor.u32 %v3752_v58, %v3057_v57  ;;  %v3030_v22 = vor.u32 %v3742_v19, %v3027_v21  ;;  %v2977_v57 = vld [vmem:[#allocation2 + $0x8] sm:$0xf] }
  0xa7   : > { %1187 = vmatpush.bf16.msra.mxu3 %v2970_v24  ;;  %v3171_v24 = vld [vmem:[#allocation2 + $0x198] sm:$0xf0] }
  0xa8   : > { %v3174_v28 = vor.u32 %v3778_v23, %v3171_v24 }
  0xaa   : > { %v620_v29 = vpop.f32.mrf.mxu0 }
  0xab   : > { %v621_v32 = vadd.f32 %v3967_v8, %v620_v29  ;;  %v3113_v29 = vld [vmem:[#allocation2 + $0x120] sm:$0xf]  ;;  %1256 = vmatpush.bf16.msrb.mxu3 %v3090_v36  ;;  %v4332_v36 = vperm.slane %v650_v26, 0 }
  0xad   : > { %v629_v39 = vmax.f32 %v621_v32, 0.0  ;;  %v3114_v32 = vor.u32 %v3767_v31, %v3113_v29  ;;  %v3780_v29 = vld [vmem:[#allocation2 + $0x194] sm:$0xf0]  ;;  %v3009_v31 = vld [vmem:[#allocation2 + $0x48] sm:$0xf] }
  0xae   : > { %v3170_v30 = vor.u32 %v3780_v29, %v3169_v25 }
  0xaf   : > { %v632_v41 = vpack.c.bf16 %v629_v39, %v628_v38  ;;  %v3094_v38 = vor.u32 %v3758_v35, %v3091_v37  ;;  %v3761_v39 = vld [vmem:[#allocation2 + $0x104] sm:$0xf]  ;;  %v3011_v35 = vld [vmem:[#allocation2 + $0x58] sm:$0xf0] }
  0xb0   : > { %v3014_v37 = vor.u32 %v3738_v33, %v3011_v35 }
  0xb1   : > { %744 = vmatmul.bf16.vlgmr.msra.gmra.mxu1 %v632_v41  ;;  %763 = vmatmul.bf16.vlgmr.msra.gmra.mxu2 %v632_v41  ;;  %v3097_v41 = vld [vmem:[#allocation2 + $0x100] sm:$0xf] }
  0xb2   : > { %v623_v42 = vpop.f32.mrf.mxu0  ;;  %1294 = vmatpush.bf16.msra.mxu1 %v3094_v38  ;;  %v3774_v38 = vld [vmem:[#allocation2 + $0x16c] sm:$0xf] }
  0xb3   : > { %v624_v43 = vadd.f32 %v3967_v8, %v623_v42  ;;  %v3102_v42 = vor.u32 %v3761_v39, %v3099_v40  ;;  %v3155_v39 = vld [vmem:[#allocation2 + $0x178] sm:$0xf0] }
  0xb4   : > { %v3158_v40 = vor.u32 %v3774_v38, %v3155_v39  ;;  %v3800_v39 = vld [vmem:[%s4645_s7 + $0x38] sm:$0xff] }
  0xb5   : > { %v630_v46 = vmax.f32 %v624_v43, 0.0  ;;  %v3763_v43 = vld [vmem:[#allocation2 + $0x10c] sm:$0xf0]  ;;  %1244 = vmatpush.bf16.msrb.mxu2 %v3102_v42  ;;  %v3776_v42 = vld [vmem:[#allocation2 + $0x174] sm:$0xf0] }
  0xb9   : > { %1313 = vmatpush.bf16.msra.mxu2 %v3222_v54 }
  0xba   : > { %v625_v44 = vpop.f32.mrf.mxu0 }
  0xbb   : > { %v626_v45 = vadd.f32 %v3967_v8, %v625_v44  ;;  %v3146_v8 = vor.u32 %v3775_v7, %v3145_v6  ;;  %v3098_v44 = vor.u32 %v3763_v43, %v3097_v41  ;;  %v3748_v6 = vld [vmem:[#allocation2 + $0x94] sm:$0xf0]  ;;  %v3746_v7 = vld [vmem:[#allocation2 + $0x8c] sm:$0xf]  ;;  %v3153_v41 = vld [vmem:[#allocation2 + $0x168] sm:$0xf] }
  0xbc   : > { %v3046_v10 = vor.u32 %v3746_v7, %v3043_v9  ;;  %v3154_v43 = vor.u32 %v3776_v42, %v3153_v41  ;;  %v3768_v7 = vld [vmem:[#allocation2 + $0x134] sm:$0xf0]  ;;  %v3798_v41 = vld [vmem:[%s4645_s7 + $0x28] sm:$0xff]  ;;  %v3807_v42 = vld [vmem:[%s4645_s7 + $0x70] sm:$0xff] }
  0xbd   : > { %v631_v47 = vmax.f32 %v626_v45, 0.0  ;;  %1203 = vmatpush.bf16.msrb.mxu0 %v3146_v8  ;;  %v3073_v45 = vld [vmem:[#allocation2 + $0xc8] sm:$0xf]  ;;  %1314 = vmatpush.bf16.msra.mxu2 %v3206_v2  ;;  %v3042_v8 = vor.u32 %v3748_v6, %v3041_v5 }
  0xbe   : > { %v3121_v6 = vld [vmem:[#allocation2 + $0x128] sm:$0xf] }
  0xbf   : > { %v633_v48 = vpack.c.bf16 %v631_v47, %v630_v46  ;;  %v3756_v46 = vld [vmem:[#allocation2 + $0xd4] sm:$0xf0]  ;;  %v3754_v47 = vld [vmem:[#allocation2 + $0xcc] sm:$0xf] }
  0xc0   : > { %v3078_v50 = vor.u32 %v3754_v47, %v3075_v49  ;;  %v2995_v49 = vld [vmem:[#allocation2 + $0x38] sm:$0xf0] }
  0xc1   : > { %749 = vmatmul.bf16.gmra.mxu1 %v633_v48  ;;  %768 = vmatmul.bf16.gmra.mxu2 %v633_v48  ;;  %v3074_v48 = vor.u32 %v3756_v46, %v3073_v45  ;;  %v3736_v45 = vld [vmem:[#allocation2 + $0x34] sm:$0xf0]  ;;  %v3734_v46 = vld [vmem:[#allocation2 + $0x2c] sm:$0xf] }
  0xc2   : > { %1204 = vmatpush.bf16.msrb.mxu0 %v3130_v20  ;;  %1295 = vmatpush.bf16.msra.mxu1 %v3078_v50  ;;  %v3026_v20 = vor.u32 %v3744_v18, %v3025_v17  ;;  %v3770_v50 = vld [vmem:[#allocation2 + $0x14c] sm:$0xf]  ;;  %v2998_v53 = vor.u32 %v3734_v46, %v2995_v49  ;;  %v3105_v17 = vld [vmem:[#allocation2 + $0x108] sm:$0xf]  ;;  %v3805_v46 = vld [vmem:[%s4645_s7 + $0x60] sm:$0xff] }
  0xc3   : > { %1257 = vmatpush.bf16.msrb.mxu3 %v3074_v48  ;;  %1315 = vmatpush.bf16.msra.mxu2 %v3190_v14  ;;  %v3142_v54 = vor.u32 %v3770_v50, %v3139_v51  ;;  %v3794_v49 = vld [vmem:[%s4645_s7 + $0x8] sm:$0xff]  ;;  %v3803_v50 = vld [vmem:[%s4645_s7 + $0x50] sm:$0xff]  ;;  %v3793_v51 = vld [vmem:[%s4645_s7] sm:$0xff] }
  0xc6   : > { %1205 = vmatpush.bf16.msrb.mxu0 %v3114_v32  ;;  %1296 = vmatpush.bf16.msra.mxu1 %v3062_v62  ;;  %v3740_v32 = vld [vmem:[#allocation2 + $0x54] sm:$0xf0]  ;;  %v2979_v62 = vld [vmem:[#allocation2 + $0x18] sm:$0xf0] }
  0xc7   : > { %1258 = vmatpush.bf16.msrb.mxu3 %v3058_v60  ;;  %1316 = vmatpush.bf16.msra.mxu2 %v3174_v28  ;;  %v3010_v34 = vor.u32 %v3740_v32, %v3009_v31  ;;  %v3732_v60 = vld [vmem:[#allocation2 + $0x14] sm:$0xf0]  ;;  %v2982_v2 = vor.u32 %v3730_v61, %v2979_v62  ;;  %v3813_v61 = vld [vmem:[%s4645_s7 + $0xa0] sm:$0xff] }
  0xc8   : > { %v2978_v1 = vor.u32 %v3732_v60, %v2977_v57  ;;  %v3823_v57 = vld [vmem:[%s4645_s7 + $0xf0] sm:$0xff]  ;;  %v3822_v60 = vld [vmem:[%s4645_s7 + $0xe8] sm:$0xff]  ;;  %v4410_v62 = vld [vmem:[%s4644_s6] sm:$0xf] }
  0xca   : > { %1206 = vmatpush.bf16.msrb.mxu0 %v3098_v44  ;;  %1297 = vmatpush.bf16.msra.mxu1 %v3046_v10  ;;  %v2993_v44 = vld [vmem:[#allocation2 + $0x28] sm:$0xf]  ;;  %v3122_v10 = vor.u32 %v3768_v7, %v3121_v6  ;;  %v3811_v6 = vld [vmem:[%s4645_s7 + $0x90] sm:$0xff] }
  0xcb   : > { %1259 = vmatpush.bf16.msrb.mxu3 %v3042_v8  ;;  %1317 = vmatpush.bf16.msra.mxu2 %v3158_v40  ;;  %v2994_v48 = vor.u32 %v3736_v45, %v2993_v44  ;;  %v3799_v40 = vld [vmem:[%s4645_s7 + $0x30] sm:$0xff]  ;;  %v3806_v44 = vld [vmem:[%s4645_s7 + $0x68] sm:$0xff]  ;;  %v3796_v45 = vld [vmem:[%s4645_s7 + $0x18] sm:$0xff] }
  0xce   : > { %1275 = vmatpush.bf16.msra.mxu0 %v3218_v56  ;;  %1298 = vmatpush.bf16.msra.mxu1 %v3030_v22  ;;  %v3772_v56 = vld [vmem:[#allocation2 + $0x154] sm:$0xf0] }
  0xcf   : > { %1260 = vmatpush.bf16.msrb.mxu3 %v3026_v20  ;;  %v3138_v59 = vor.u32 %v3772_v56, %v3137_v55  ;;  %1318 = vmatpush.bf16.msra.mxu2 %v3142_v54  ;;  %v3764_v20 = vld [vmem:[#allocation2 + $0x114] sm:$0xf0]  ;;  %v3815_v56 = vld [vmem:[%s4645_s7 + $0xb0] sm:$0xff] }
  0xd0   : > { %v3106_v23 = vor.u32 %v3764_v20, %v3105_v17  ;;  %v3816_v54 = vld [vmem:[%s4645_s7 + $0xb8] sm:$0xff]  ;;  %v3809_v20 = vld [vmem:[%s4645_s7 + $0x80] sm:$0xff] }
  0xd1   : > { %v3824_v55 = vld [vmem:[%s4645_s7 + $0xf8] sm:$0xff] }
  0xd2   : > { %1276 = vmatpush.bf16.msra.mxu0 %v3202_v4  ;;  %1299 = vmatpush.bf16.msra.mxu1 %v3014_v37  ;;  %v3123_v4 = vld [vmem:[#allocation2 + $0x138] sm:$0xf0] }
  0xd3   : > { %1261 = vmatpush.bf16.msrb.mxu3 %v3010_v34  ;;  %v3126_v5 = vor.u32 %v3766_v3, %v3123_v4  ;;  %v852_v3 = vperm.slane %v4410_v62, 0 }
  0xd5   : > { %1319 = vmatpush.bf16.msra.mxu2 %v3126_v5  ;;  %v3820_v5 = vld [vmem:[%s4645_s7 + $0xd8] sm:$0xff] }
  0xd6   : > { %1277 = vmatpush.bf16.msra.mxu0 %v3186_v16  ;;  %1300 = vmatpush.bf16.msra.mxu1 %v2998_v53  ;;  %v3107_v16 = vld [vmem:[#allocation2 + $0x118] sm:$0xf0]  ;;  %v3801_v53 = vld [vmem:[%s4645_s7 + $0x40] sm:$0xff] }
  0xd7   : > { %1262 = vmatpush.bf16.msrb.mxu3 %v2994_v48  ;;  %v3110_v19 = vor.u32 %v3762_v15, %v3107_v16  ;;  %v3804_v48 = vld [vmem:[%s4645_s7 + $0x58] sm:$0xff] }
  0xd9   : > { %1320 = vmatpush.bf16.msra.mxu2 %v3110_v19  ;;  %v3818_v19 = vld [vmem:[%s4645_s7 + $0xc8] sm:$0xff] }
  0xda   : > { %1278 = vmatpush.bf16.msra.mxu0 %v3170_v30  ;;  %1301 = vmatpush.bf16.msra.mxu1 %v2982_v2  ;;  %v3812_v2 = vld [vmem:[%s4645_s7 + $0x98] sm:$0xff] }
  0xdb   : > { %1263 = vmatpush.bf16.msrb.mxu3 %v2978_v1  ;;  %v3821_v1 = vld [vmem:[%s4645_s7 + $0xe0] sm:$0xff] }
  0xde   : > { %1279 = vmatpush.bf16.msra.mxu0 %v3154_v43  ;;  %v3797_v43 = vld [vmem:[%s4645_s7 + $0x20] sm:$0xff] }
  0xe2   : > { %1280 = vmatpush.bf16.msra.mxu0 %v3138_v59 }
  0xe6   : > { %1281 = vmatpush.bf16.msra.mxu0 %v3122_v10 }
  0xea   : > { %1282 = vmatpush.bf16.msra.mxu0 %v3106_v23 }
 0x12e   : > { %v745_v27 = vpop.f32.mrf.mxu1 }
 0x12f   : > { %v746_v52 = vadd.f32 %v745_v27, %v4332_v36 }
 0x131   : > { %v774_v8 = vmax.f32 %v746_v52, 0.0  ;;  %v3802_v52 = vld [vmem:[%s4645_s7 + $0x48] sm:$0xff] }
 0x134   : > { %v764_v47 = vpop.f32.mrf.mxu2 }
 0x135   : > { %v765_v11 = vadd.f32 %v764_v47, %v653_v63  ;;  %v3795_v47 = vld [vmem:[%s4645_s7 + $0x10] sm:$0xff] }
 0x136   : > { %v747_v58 = vpop.f32.mrf.mxu1 }
 0x137   : > { %v748_v0 = vadd.f32 %v747_v58, %v4332_v36  ;;  %v775_v21 = vmax.f32 %v765_v11, 0.0  ;;  %v3814_v58 = vld [vmem:[%s4645_s7 + $0xa8] sm:$0xff] }
 0x139   : > { %v776_v9 = vmax.f32 %v748_v0, 0.0 }
 0x13b   : > { %v782_v12 = vpack.c.bf16 %v776_v9, %v774_v8  ;;  %v853_v9 = vperm.slane %v4410_v62, 1 }
 0x13c   : > { %v766_v13 = vpop.f32.mrf.mxu2 }
 0x13d   : > { %v767_v14 = vadd.f32 %v766_v13, %v653_v63  ;;  %1188 = vmatmul.bf16.vlgmr.msra.gmra.mxu3 %v782_v12  ;;  %1226 = vmatmul.bf16.vlgmr.msrb.gmra.mxu1 %v782_v12  ;;  %v3810_v13 = vld [vmem:[%s4645_s7 + $0x88] sm:$0xff] }
 0x13e   : > { %v750_v18 = vpop.f32.mrf.mxu1  ;;  %1616 = vmatpush.bf16.msra.mxu3 %v3800_v39  ;;  %1654 = vmatpush.bf16.msrb.mxu1 %v3816_v54 }
 0x13f   : > { %v777_v22 = vmax.f32 %v767_v14, 0.0  ;;  %v751_v26 = vadd.f32 %v750_v18, %v4332_v36 }
 0x141   : > { %v783_v24 = vpack.c.bf16 %v777_v22, %v775_v21  ;;  %v778_v29 = vmax.f32 %v751_v26, 0.0 }
 0x142   : > { %1617 = vmatpush.bf16.msra.mxu3 %v3799_v40  ;;  %1655 = vmatpush.bf16.msrb.mxu1 %v3815_v56 }
 0x143   : > { %1207 = vmatmul.bf16.vlgmr.msrb.gmra.mxu0 %v783_v24  ;;  %1245 = vmatmul.bf16.vlgmr.msrb.gmra.mxu2 %v783_v24 }
 0x144   : > { %v769_v25 = vpop.f32.mrf.mxu2  ;;  %1673 = vmatpush.bf16.msrb.mxu2 %v3824_v55  ;;  %v854_v55 = vperm.slane %v4410_v62, 2 }
 0x145   : > { %v770_v31 = vadd.f32 %v769_v25, %v653_v63 }
 0x146   : > { %v752_v27 = vpop.f32.mrf.mxu1  ;;  %1618 = vmatpush.bf16.msra.mxu3 %v3798_v41  ;;  %1656 = vmatpush.bf16.msrb.mxu1 %v3814_v58 }
 0x147   : > { %v753_v28 = vadd.f32 %v752_v27, %v4332_v36  ;;  %v779_v35 = vmax.f32 %v770_v31, 0.0  ;;  %v3808_v36 = vld [vmem:[%s4645_s7 + $0x78] sm:$0xff] }
 0x148   : > { %1635 = vmatpush.bf16.msrb.mxu0 %v3808_v36  ;;  %1674 = vmatpush.bf16.msrb.mxu2 %v3823_v57 }
 0x149   : > { %v780_v30 = vmax.f32 %v753_v28, 0.0 }
 0x14a   : > { %1619 = vmatpush.bf16.msra.mxu3 %v3797_v43  ;;  %1657 = vmatpush.bf16.msrb.mxu1 %v3813_v61 }
 0x14b   : > { %v784_v32 = vpack.c.bf16 %v780_v30, %v778_v29  ;;  %v3817_v30 = vld [vmem:[%s4645_s7 + $0xc0] sm:$0xff] }
 0x14c   : > { %v771_v33 = vpop.f32.mrf.mxu2  ;;  %1636 = vmatpush.bf16.msrb.mxu0 %v3807_v42  ;;  %1675 = vmatpush.bf16.msrb.mxu2 %v3822_v60  ;;  %v855_v60 = vperm.slane %v4410_v62, 3 }
 0x14d   : > { %v772_v34 = vadd.f32 %v771_v33, %v653_v63  ;;  %1193 = vmatmul.bf16.gmra.mxu3 %v784_v32  ;;  %1231 = vmatmul.bf16.gmra.mxu1 %v784_v32 }
 0x14e   : > { %1620 = vmatpush.bf16.msra.mxu3 %v3796_v45  ;;  %1658 = vmatpush.bf16.msrb.mxu1 %v3812_v2 }
 0x14f   : > { %v781_v37 = vmax.f32 %v772_v34, 0.0 }
 0x150   : > { %1637 = vmatpush.bf16.msrb.mxu0 %v3806_v44  ;;  %1676 = vmatpush.bf16.msrb.mxu2 %v3821_v1 }
 0x151   : > { %v785_v38 = vpack.c.bf16 %v781_v37, %v779_v35 }
 0x152   : > { %1621 = vmatpush.bf16.msra.mxu3 %v3795_v47  ;;  %1659 = vmatpush.bf16.msrb.mxu1 %v3811_v6 }
 0x153   : > { %1212 = vmatmul.bf16.gmra.mxu0 %v785_v38  ;;  %1250 = vmatmul.bf16.gmra.mxu2 %v785_v38 }
 0x154   : > { %1638 = vmatpush.bf16.msrb.mxu0 %v3805_v46  ;;  %1677 = vmatpush.bf16.msrb.mxu2 %v3820_v5 }
 0x156   : > { %1622 = vmatpush.bf16.msra.mxu3 %v3794_v49  ;;  %1660 = vmatpush.bf16.msrb.mxu1 %v3810_v13 }
 0x158   : > { %1639 = vmatpush.bf16.msrb.mxu0 %v3804_v48 }
 0x15a   : > { %1623 = vmatpush.bf16.msra.mxu3 %v3793_v51  ;;  %1661 = vmatpush.bf16.msrb.mxu1 %v3809_v20 }
 0x15c   : > { %1640 = vmatpush.bf16.msrb.mxu0 %v3803_v50 }
 0x15d   : > { %1264 = vmatmul.bf16.vlgmr.msrb.gmra.mxu3 %v782_v12  ;;  %1302 = vmatmul.bf16.vlgmr.msra.gmra.mxu1 %v782_v12  ;;  %v3819_v12 = vld [vmem:[%s4645_s7 + $0xd0] sm:$0xff] }
 0x15e   : > { %1678 = vmatpush.bf16.msrb.mxu2 %v3819_v12 }
 0x160   : > { %1641 = vmatpush.bf16.msrb.mxu0 %v3802_v52 }
 0x162   : > { %1679 = vmatpush.bf16.msrb.mxu2 %v3818_v19 }
 0x163   : > { %1283 = vmatmul.bf16.vlgmr.msra.gmra.mxu0 %v783_v24  ;;  %1321 = vmatmul.bf16.vlgmr.msra.gmra.mxu2 %v783_v24 }
 0x164   : > { %1642 = vmatpush.bf16.msrb.mxu0 %v3801_v53 }
 0x166   : > { %1680 = vmatpush.bf16.msrb.mxu2 %v3817_v30 }
 0x16d   : > { %1269 = vmatmul.bf16.gmra.mxu3 %v784_v32  ;;  %1307 = vmatmul.bf16.gmra.mxu1 %v784_v32 }
 0x173   : > { %1288 = vmatmul.bf16.gmra.mxu0 %v785_v38  ;;  %1326 = vmatmul.bf16.gmra.mxu2 %v785_v38 }
 0x1ba   : > { %v1227_v59 = vpop.f32.mrf.mxu1 }
 0x1bb   : > { %v1228_v17 = vadd.f32 %v1227_v59, %v853_v9 }
 0x1c0   : > { %v1189_v63 = vpop.f32.mrf.mxu3  ;;  %v1208_v0 = vpop.f32.mrf.mxu0 }
 0x1c1   : > { %v1190_v7 = vadd.f32 %v1189_v63, %v852_v3 }
 0x1c2   : > { %v1229_v4 = vpop.f32.mrf.mxu1 }
 0x1c3   : > { %v1209_v14 = vadd.f32 %v1208_v0, %v1190_v7  ;;  %v1230_v22 = vadd.f32 %v1229_v4, %v853_v9 }
 0x1c5   : > { %v1332_v21 = vmax.f32 %v1209_v14, 0.0 }
 0x1c6   : > { %v1246_v8 = vpop.f32.mrf.mxu2 }
 0x1c7   : > { %v1247_v23 = vadd.f32 %v1246_v8, %v1228_v17 }
 0x1c8   : > { %v1191_v10 = vpop.f32.mrf.mxu3  ;;  %v1210_v11 = vpop.f32.mrf.mxu0 }
 0x1c9   : > { %v1192_v15 = vadd.f32 %v1191_v10, %v852_v3  ;;  %v1333_v31 = vmax.f32 %v1247_v23, 0.0 }
 0x1ca   : > { %v1232_v16 = vpop.f32.mrf.mxu1 }
 0x1cb   : > { %v1211_v18 = vadd.f32 %v1210_v11, %v1192_v15  ;;  %v1233_v41 = vadd.f32 %v1232_v16, %v853_v9 }
 0x1cd   : > { %v1336_v24 = vmax.f32 %v1211_v18, 0.0 }
 0x1ce   : > { %v1248_v25 = vpop.f32.mrf.mxu2 }
 0x1cf   : > { %v1348_v26 = vpack.c.bf16 %v1336_v24, %v1332_v21  ;;  %v1249_v27 = vadd.f32 %v1248_v25, %v1230_v22 }
 0x1d0   : > { %v1194_v28 = vpop.f32.mrf.mxu3  ;;  %v1213_v29 = vpop.f32.mrf.mxu0 }
 0x1d1   : > { %v1337_v32 = vmax.f32 %v1249_v27, 0.0  ;;  %1624 = vmatmul.bf16.vlgmr.msra.gmra.mxu3 %v1348_v26  ;;  %v1195_v35 = vadd.f32 %v1194_v28, %v852_v3 }
 0x1d2   : > { %v1234_v33 = vpop.f32.mrf.mxu1 }
 0x1d3   : > { %v1349_v34 = vpack.c.bf16 %v1337_v32, %v1333_v31  ;;  %v1214_v36 = vadd.f32 %v1213_v29, %v1195_v35  ;;  %v1235_v45 = vadd.f32 %v1234_v33, %v853_v9 }
 0x1d5   : > { %1643 = vmatmul.bf16.vlgmr.msrb.gmra.mxu0 %v1349_v34  ;;  %v1340_v44 = vmax.f32 %v1214_v36, 0.0 }
 0x1d6   : > { %v1251_v37 = vpop.f32.mrf.mxu2 }
 0x1d7   : > { %v1252_v46 = vadd.f32 %v1251_v37, %v1233_v41 }
 0x1d8   : > { %v1196_v38 = vpop.f32.mrf.mxu3  ;;  %v1215_v39 = vpop.f32.mrf.mxu0 }
 0x1d9   : > { %v1197_v40 = vadd.f32 %v1196_v38, %v852_v3  ;;  %v1341_v53 = vmax.f32 %v1252_v46, 0.0  ;;  %v3968_v38 = vld [vmem:[%s4646_s8] ss:$0 sm:$0xff] }
 0x1da   : > { %v1303_v43 = vpop.f32.mrf.mxu1 }
 0x1db   : > { %v1216_v42 = vadd.f32 %v1215_v39, %v1197_v40  ;;  %v1304_v2 = vadd.f32 %v1303_v43, %v855_v60 }
 0x1dd   : > { %v1344_v47 = vmax.f32 %v1216_v42, 0.0 }
 0x1de   : > { %v1253_v48 = vpop.f32.mrf.mxu2 }
 0x1df   : > { %v1254_v49 = vadd.f32 %v1253_v48, %v1235_v45  ;;  %v1352_v50 = vpack.c.bf16 %v1344_v47, %v1340_v44 }
 0x1e0   : > { %v1265_v51 = vpop.f32.mrf.mxu3  ;;  %v1284_v52 = vpop.f32.mrf.mxu0 }
 0x1e1   : > { %v1345_v54 = vmax.f32 %v1254_v49, 0.0  ;;  %1629 = vmatmul.bf16.gmra.mxu3 %v1352_v50  ;;  %v1266_v57 = vadd.f32 %v1265_v51, %v854_v55 }
 0x1e2   : > { %v1305_v58 = vpop.f32.mrf.mxu1 }
 0x1e3   : > { %v1353_v56 = vpack.c.bf16 %v1345_v54, %v1341_v53  ;;  %v1285_v0 = vadd.f32 %v1284_v52, %v1266_v57  ;;  %v1306_v5 = vadd.f32 %v1305_v58, %v855_v60 }
 0x1e5   : > { %1648 = vmatmul.bf16.gmra.mxu0 %v1353_v56  ;;  %v1334_v4 = vmax.f32 %v1285_v0, 0.0 }
 0x1e6   : > { %v1322_v59 = vpop.f32.mrf.mxu2 }
 0x1e7   : > { %v1323_v6 = vadd.f32 %v1322_v59, %v1304_v2 }
 0x1e8   : > { %v1267_v61 = vpop.f32.mrf.mxu3  ;;  %v1286_v63 = vpop.f32.mrf.mxu0 }
 0x1e9   : > { %v1268_v1 = vadd.f32 %v1267_v61, %v854_v55  ;;  %v1335_v14 = vmax.f32 %v1323_v6, 0.0 }
 0x1ea   : > { %v1308_v10 = vpop.f32.mrf.mxu1 }
 0x1eb   : > { %v1287_v3 = vadd.f32 %v1286_v63, %v1268_v1  ;;  %v1309_v23 = vadd.f32 %v1308_v10, %v855_v60 }
 0x1ed   : > { %v1338_v7 = vmax.f32 %v1287_v3, 0.0 }
 0x1ee   : > { %v1324_v8 = vpop.f32.mrf.mxu2 }
 0x1ef   : > { %v1350_v9 = vpack.c.bf16 %v1338_v7, %v1334_v4  ;;  %v1325_v11 = vadd.f32 %v1324_v8, %v1306_v5 }
 0x1f0   : > { %v1270_v12 = vpop.f32.mrf.mxu3  ;;  %v1289_v13 = vpop.f32.mrf.mxu0 }
 0x1f1   : > { %v1339_v15 = vmax.f32 %v1325_v11, 0.0  ;;  %1662 = vmatmul.bf16.vlgmr.msrb.gmra.mxu1 %v1350_v9  ;;  %v1271_v16 = vadd.f32 %v1270_v12, %v854_v55 }
 0x1f2   : > { %v1310_v21 = vpop.f32.mrf.mxu1 }
 0x1f3   : > { %v1351_v62 = vpack.c.bf16 %v1339_v15, %v1335_v14  ;;  %v1290_v19 = vadd.f32 %v1289_v13, %v1271_v16  ;;  %v1311_v26 = vadd.f32 %v1310_v21, %v855_v60  ;;  %v1767_v16 = vld [vmem:[%s4647_s9] sm:$0xff] }
 0x1f5   : > { %1681 = vmatmul.bf16.vlgmr.msrb.gmra.mxu2 %v1351_v62  ;;  %v1342_v25 = vmax.f32 %v1290_v19, 0.0 }
 0x1f6   : > { %v1327_v17 = vpop.f32.mrf.mxu2 }
 0x1f7   : > { %v1328_v27 = vadd.f32 %v1327_v17, %v1309_v23  ;;  %v1768_v17 = vld [vmem:[%s4647_s9 + $0x8] sm:$0xff] }
 0x1f8   : > { %v1272_v18 = vpop.f32.mrf.mxu3  ;;  %v1291_v22 = vpop.f32.mrf.mxu0  ;;  %v1784_v19 = vunpack.c.h.b16 %v1768_v17 }
 0x1f9   : > { %v1273_v20 = vadd.f32 %v1272_v18, %v854_v55  ;;  %v1343_v32 = vmax.f32 %v1328_v27, 0.0  ;;  %v1781_v18 = vunpack.c.l.b16 %v1767_v16 }
 0x1fa   : > { %v1788_v21 = vpack.c.b16 %v1784_v19, %v1784_v19  ;;  %v3601_v19 = vld [vmem:[#allocation4 + $0x1e0] sm:$0xf] }
 0x1fb   : > { %v1292_v24 = vadd.f32 %v1291_v22, %v1273_v20  ;;  %v1785_v20 = vpack.c.b16 %v1781_v18, %v1781_v18 }
 0x1fc   : > { %v1805_v23 = vsel %vm605_vm0, %v1788_v21, 0 }
 0x1fd   : > { %v1346_v28 = vmax.f32 %v1292_v24, 0.0  ;;  %v1796_v22 = vsel %vm605_vm0, %v1785_v20, 0  ;;  %1871 = vmatpush.bf16.msra.mxu2 %v1805_v23  ;;  %v3886_v20 = vld [vmem:[#allocation4 + $0x1e4] sm:$0xf0]  ;;  %v3457_v23 = vld [vmem:[#allocation4 + $0xc0] sm:$0xf] }
 0x1fe   : > { %v1329_v29 = vpop.f32.mrf.mxu2  ;;  %1814 = vmatpush.bf16.msrb.mxu3 %v1796_v22  ;;  %v3602_v22 = vor.u32 %v3886_v20, %v3601_v19  ;;  %v3842_v19 = vld [vmem:[#allocation4 + $0x84] sm:$0xf0]  ;;  %v3489_v20 = vld [vmem:[#allocation4 + $0x100] sm:$0xf] }
 0x1ff   : > { %v1330_v30 = vadd.f32 %v1329_v29, %v1311_v26  ;;  %v1354_v31 = vpack.c.bf16 %v1346_v28, %v1342_v25  ;;  %v3995_v28 = vld [vmem:[%s4218_s19] sm:$0xff] }
 0x201   : > { %v1347_v33 = vmax.f32 %v1330_v30, 0.0  ;;  %1667 = vmatmul.bf16.gmra.mxu1 %v1354_v31  ;;  %v3996_v31 = vld [vmem:[%s4218_s19 + $0x8] sm:$0xff] }
 0x203   : > { %v1355_v34 = vpack.c.bf16 %v1347_v33, %v1343_v32 }
 0x205   : > { %1686 = vmatmul.bf16.gmra.mxu2 %v1355_v34 }
 0x252   : > { %v1644_v37 = vpop.f32.mrf.mxu0 }
 0x254   : > { %v1625_v35 = vpop.f32.mrf.mxu3 }
 0x255   : > { %v1626_v36 = vadd.f32 %v3968_v38, %v1625_v35 }
 0x257   : > { %v1645_v41 = vadd.f32 %v1644_v37, %v1626_v36 }
 0x25a   : > { %v1646_v42 = vpop.f32.mrf.mxu0 }
 0x25c   : > { %v1627_v40 = vpop.f32.mrf.mxu3 }
 0x25d   : > { %v1628_v46 = vadd.f32 %v3968_v38, %v1627_v40  ;;  %v3998_v40 = vld [vmem:[%s4218_s19 + $0x18] sm:$0xff] }
 0x25f   : > { %v1647_v50 = vadd.f32 %v1646_v42, %v1628_v46  ;;  %v1782_v46 = vunpack.c.h.b16 %v1767_v16  ;;  %v3409_v16 = vld [vmem:[#allocation4 + $0x60] sm:$0xf] }
 0x262   : > { %v1649_v56 = vpop.f32.mrf.mxu0 }
 0x264   : > { %v1630_v49 = vpop.f32.mrf.mxu3 }
 0x265   : > { %v1631_v54 = vadd.f32 %v3968_v38, %v1630_v49 }
 0x267   : > { %v1650_v60 = vadd.f32 %v1649_v56, %v1631_v54 }
 0x26a   : > { %v1651_v5 = vpop.f32.mrf.mxu0 }
 0x26c   : > { %v1632_v63 = vpop.f32.mrf.mxu3 }
 0x26d   : > { %v1633_v2 = vadd.f32 %v3968_v38, %v1632_v63  ;;  %v3872_v63 = vld [vmem:[#allocation4 + $0x174] sm:$0xf0] }
 0x26e   : > { %v1663_v39 = vpop.f32.mrf.mxu1 }
 0x26f   : > { %v1664_v43 = vadd.f32 %v1663_v39, %v1645_v41  ;;  %v1652_v8 = vadd.f32 %v1651_v5, %v1633_v2  ;;  %v3997_v39 = vld [vmem:[%s4218_s19 + $0x10] sm:$0xff] }
 0x270   : > { %v3417_v5 = vld [vmem:[#allocation4 + $0x70] sm:$0xf] }
 0x276   : > { %v1665_v44 = vpop.f32.mrf.mxu1 }
 0x277   : > { %v1666_v52 = vadd.f32 %v1665_v44, %v1647_v50 }
 0x278   : > { %v1682_v45 = vpop.f32.mrf.mxu2 }
 0x279   : > { %v1683_v47 = vadd.f32 %v1682_v45, %v1664_v43 }
 0x27b   : > { %v1692_v48 = vmul.f32 0.5, %v1683_v47  ;;  %1728 = vrot.lane.b32.xlu1 %v1683_v47, %s4081_s25  ;;  %v1783_v47 = vunpack.c.l.b16 %v1768_v17  ;;  %v3838_v17 = vld [vmem:[#allocation4 + $0x64] sm:$0xf0] }
 0x27c   : > { %v3410_v18 = vor.u32 %v3838_v17, %v3409_v16  ;;  %v3878_v16 = vld [vmem:[#allocation4 + $0x1a4] sm:$0xf0] }
 0x27d   : > { %v1696_v51 = vmul.f32 1.442695, %v1692_v48  ;;  %v1786_v48 = vpack.c.b16 %v1782_v46, %v1782_v46  ;;  %v1787_v49 = vpack.c.b16 %v1783_v47, %v1783_v47  ;;  %v3449_v46 = vld [vmem:[#allocation4 + $0xb0] sm:$0xf]  ;;  %v3848_v47 = vld [vmem:[#allocation4 + $0xb4] sm:$0xf0] }
 0x27e   : > { %v1668_v57 = vpop.f32.mrf.mxu1 }
 0x27f   : > { %3971 = vpow2.f32 %v1696_v51  ;;  %v1669_v0 = vadd.f32 %v1668_v57, %v1650_v60  ;;  %v1799_v50 = vsel %vm605_vm0, %v1786_v48, 0  ;;  %v1802_v51 = vsel %vm605_vm0, %v1787_v49, 0  ;;  %v3545_v60 = vld [vmem:[#allocation4 + $0x170] sm:$0xf] }
 0x280   : > { %v1684_v53 = vpop.f32.mrf.mxu2  ;;  %1833 = vmatpush.bf16.msra.mxu0 %v1799_v50  ;;  %1852 = vmatpush.bf16.msra.mxu1 %v1802_v51  ;;  %v3546_v2 = vor.u32 %v3872_v63, %v3545_v60  ;;  %v3513_v48 = vld [vmem:[#allocation4 + $0x130] sm:$0xf]  ;;  %v3450_v49 = vor.u32 %v3848_v47, %v3449_v46  ;;  %v3864_v50 = vld [vmem:[#allocation4 + $0x134] sm:$0xf0]  ;;  %v3505_v60 = vld [vmem:[#allocation4 + $0x120] sm:$0xf] }
 0x281   : > { %v1685_v55 = vadd.f32 %v1684_v53, %v1666_v52  ;;  %v3514_v51 = vor.u32 %v3864_v50, %v3513_v48  ;;  %v3862_v63 = vld [vmem:[#allocation4 + $0x124] sm:$0xf0]  ;;  %v1769_v46 = vld [vmem:[%s4648_s10] sm:$0xf]  ;;  %v3853_v48 = vld [vmem:[#allocation4 + $0xe4] sm:$0xf] }
 0x282   : > { %v3869_v50 = vld [vmem:[#allocation4 + $0x164] sm:$0xf] }
 0x283   : > { %v1693_v58 = vmul.f32 0.5, %v1685_v55  ;;  %1730 = vrot.lane.b32.xlu1 %v1685_v55, %s4081_s25 }
 0x284   : > { %2335 = vmatpush.bf16.msrb.mxu1 %v3546_v2  ;;  %v3832_v2 = vld [vmem:[#allocation4 + $0x34] sm:$0xf0] }
 0x285   : > { %v3972_v59 = vpop.eup %3971  ;;  %v1698_v61 = vmul.f32 1.442695, %v1693_v58  ;;  %v3481_v58 = vld [vmem:[#allocation4 + $0xf0] sm:$0xf] }
 0x286   : > { %1708 = vrot.lane.b32.xlu0 %v3972_v59, %s4082_s26  ;;  %v1670_v6 = vpop.f32.mrf.mxu1  ;;  %v3856_v59 = vld [vmem:[#allocation4 + $0xf4] sm:$0xf0] }
 0x287   : > { %3973 = vpow2.f32 %v1698_v61  ;;  %v1671_v10 = vadd.f32 %v1670_v6, %v1652_v8  ;;  %v3482_v61 = vor.u32 %v3856_v59, %v3481_v58  ;;  %v3609_v8 = vld [vmem:[#allocation4 + $0x1f0] sm:$0xf]  ;;  %v3441_v58 = vld [vmem:[#allocation4 + $0xa0] sm:$0xf]  ;;  %v3846_v59 = vld [vmem:[#allocation4 + $0xa4] sm:$0xf0] }
 0x288   : > { %v1687_v1 = vpop.f32.mrf.mxu2 }
 0x289   : > { %v1688_v3 = vadd.f32 %v1687_v1, %v1669_v0  ;;  %v3473_v0 = vld [vmem:[#allocation4 + $0xe0] sm:$0xf]  ;;  %v3854_v1 = vld [vmem:[#allocation4 + $0xe4] sm:$0xf0]  ;;  %2316 = vmatpush.bf16.msrb.mxu0 %v3482_v61  ;;  %v3442_v61 = vor.u32 %v3846_v59, %v3441_v58  ;;  %v4491_v58 = vperm.slane %v1769_v46, 1 }
 0x28a   : > { %v3474_v6 = vor.u32 %v3854_v1, %v3473_v0  ;;  %v3506_v0 = vor.u32 %v3862_v63, %v3505_v60  ;;  %v3385_v1 = vld [vmem:[#allocation4 + $0x30] sm:$0xf]  ;;  %v3611_v60 = vld [vmem:[#allocation4 + $0x1f8] sm:$0xf0] }
 0x28b   : > { %v1694_v4 = vmul.f32 0.5, %v1688_v3 }
 0x28d   : > { %v3974_v7 = vpop.eup %3973  ;;  %v1700_v9 = vmul.f32 1.442695, %v1694_v4  ;;  %v3870_v4 = vld [vmem:[#allocation4 + $0x164] sm:$0xf0]  ;;  %2317 = vmatpush.bf16.msrb.mxu0 %v3474_v6 }
 0x28e   : > { %1710 = vrot.lane.b32.xlu0 %v3974_v7, %s4082_s26  ;;  %v3840_v7 = vld [vmem:[#allocation4 + $0x74] sm:$0xf0] }
 0x28f   : > { %3975 = vpow2.f32 %v1700_v9  ;;  %v3888_v9 = vld [vmem:[#allocation4 + $0x1f4] sm:$0xf0] }
 0x290   : > { %v1689_v11 = vpop.f32.mrf.mxu2 }
 0x291   : > { %v1690_v12 = vadd.f32 %v1689_v11, %v1671_v10  ;;  %v3418_v11 = vor.u32 %v3840_v7, %v3417_v5  ;;  %v3880_v5 = vld [vmem:[#allocation4 + $0x1b4] sm:$0xf0]  ;;  %v3433_v7 = vld [vmem:[#allocation4 + $0x90] sm:$0xf] }
 0x293   : > { %v1695_v13 = vmul.f32 0.5, %v1690_v12  ;;  %1734 = vrot.lane.b32.xlu1 %v1690_v12, %s4081_s25  ;;  %v3610_v12 = vor.u32 %v3888_v9, %v3609_v8  ;;  %2297 = vmatpush.bf16.msra.mxu3 %v3418_v11  ;;  %v3844_v8 = vld [vmem:[#allocation4 + $0x94] sm:$0xf0] }
 0x294   : > { %v3434_v9 = vor.u32 %v3844_v8, %v3433_v7  ;;  %v3860_v11 = vld [vmem:[#allocation4 + $0x114] sm:$0xf0]  ;;  %v3837_v7 = vld [vmem:[#allocation4 + $0x64] sm:$0xf]  ;;  %v3411_v8 = vld [vmem:[#allocation4 + $0x68] sm:$0xf0] }
 0x295   : > { %v3976_v14 = vpop.eup %3975  ;;  %v1702_v15 = vmul.f32 1.442695, %v1695_v13  ;;  %v3465_v13 = vld [vmem:[#allocation4 + $0xd0] sm:$0xf]  ;;  %2354 = vmatpush.bf16.msrb.mxu2 %v3610_v12 }
 0x296   : > { %1712 = vrot.lane.b32.xlu2 %v3976_v14, %s4082_s26  ;;  %1732 = vrot.lane.b32.xlu0 %v1688_v3, %s4081_s25  ;;  %v3537_v3 = vld [vmem:[#allocation4 + $0x160] sm:$0xf]  ;;  %v3852_v14 = vld [vmem:[#allocation4 + $0xd4] sm:$0xf0]  ;;  %s4617_s25 = scalar_lea.vmem %s4655_s17, %s2898_s5 }
 0x297   : > { %3977 = vpow2.f32 %v1702_v15  ;;  %v3538_v10 = vor.u32 %v3870_v4, %v3537_v3  ;;  %v3529_v15 = vld [vmem:[#allocation4 + $0x150] sm:$0xf]  ;;  %v3466_v21 = vor.u32 %v3852_v14, %v3465_v13  ;;  %2298 = vmatpush.bf16.msra.mxu3 %v3410_v18  ;;  %v3386_v3 = vor.u32 %v3832_v2, %v3385_v1  ;;  %v3377_v13 = vld [vmem:[#allocation4 + $0x20] sm:$0xf]  ;;  %v3830_v14 = vld [vmem:[#allocation4 + $0x24] sm:$0xf0] }
 0x298   : > { %v3577_v4 = vld [vmem:[#allocation4 + $0x1b0] sm:$0xf]  ;;  %v3425_v18 = vld [vmem:[#allocation4 + $0x80] sm:$0xf]  ;;  %v3467_v1 = vld [vmem:[#allocation4 + $0xd8] sm:$0xf0] }
 0x299   : > { %2336 = vmatpush.bf16.msrb.mxu1 %v3538_v10  ;;  %2355 = vmatpush.bf16.msrb.mxu2 %v3602_v22  ;;  %v3578_v6 = vor.u32 %v3880_v5, %v3577_v4  ;;  %v3497_v10 = vld [vmem:[#allocation4 + $0x110] sm:$0xf]  ;;  %v3858_v22 = vld [vmem:[#allocation4 + $0x104] sm:$0xf0]  ;;  %v3531_v4 = vld [vmem:[#allocation4 + $0x158] sm:$0xf0] }
 0x29a   : > { %2318 = vmatpush.bf16.msrb.mxu0 %v3466_v21  ;;  %v3498_v12 = vor.u32 %v3860_v11, %v3497_v10  ;;  %v3426_v21 = vor.u32 %v3842_v19, %v3425_v18  ;;  %v3865_v18 = vld [vmem:[#allocation4 + $0x144] sm:$0xf]  ;;  %v4497_v19 = vperm.slane %v1769_v46, 0 }
 0x29d   : > { %v3978_v62 = vpop.eup %3977 }
 0x29e   : > { %1714 = vrot.lane.b32.xlu2 %v3978_v62, %s4082_s26  ;;  %v3868_v62 = vld [vmem:[#allocation4 + $0x154] sm:$0xf0] }
 0x2ed   : > { %v4458_v24 = vpop.permute.xlu1 %1728 }
 0x2f0   : > { %v1713_v26 = vpop.permute.xlu2 %1712 }
 0x2f1   : > { %v1722_v36 = vmul.f32 %v3997_v39, %v1713_v26  ;;  %v3530_v26 = vor.u32 %v3868_v62, %v3529_v15  ;;  %v3569_v15 = vld [vmem:[#allocation4 + $0x1a0] sm:$0xf]  ;;  %v3378_v62 = vor.u32 %v3830_v14, %v3377_v13  ;;  %v3603_v13 = vld [vmem:[#allocation4 + $0x1e8] sm:$0xf0] }
 0x2f2   : > { %v3570_v17 = vor.u32 %v3878_v16, %v3569_v15  ;;  %v3849_v16 = vld [vmem:[#allocation4 + $0xc4] sm:$0xf] }
 0x2f3   : > { %2337 = vmatpush.bf16.msrb.mxu1 %v3530_v26  ;;  %v3828_v26 = vld [vmem:[#allocation4 + $0x14] sm:$0xf0] }
 0x2f5   : > { %v4460_v27 = vpop.permute.xlu1 %1730 }
 0x2f8   : > { %v1709_v25 = vpop.permute.xlu0 %1708  ;;  %v1715_v35 = vpop.permute.xlu2 %1714 }
 0x2f9   : > { %v1720_v29 = vmul.f32 %v3995_v28, %v1709_v25  ;;  %v1723_v41 = vmul.f32 %v3998_v40, %v1715_v35  ;;  %v3850_v25 = vld [vmem:[#allocation4 + $0xc4] sm:$0xf0]  ;;  %v3401_v28 = vld [vmem:[#allocation4 + $0x50] sm:$0xf] }
 0x2fb   : > { %v1740_v33 = vadd.f32 %v4458_v24, %v1720_v29  ;;  %v3836_v29 = vld [vmem:[#allocation4 + $0x54] sm:$0xf0] }
 0x300   : > { %v1711_v30 = vpop.permute.xlu0 %1710 }
 0x301   : > { %v1721_v32 = vmul.f32 %v3996_v31, %v1711_v30  ;;  %v3593_v30 = vld [vmem:[#allocation4 + $0x1d0] sm:$0xf]  ;;  %v3521_v31 = vld [vmem:[#allocation4 + $0x140] sm:$0xf] }
 0x303   : > { %v1741_v34 = vadd.f32 %v4460_v27, %v1721_v32  ;;  %v3866_v32 = vld [vmem:[#allocation4 + $0x144] sm:$0xf0] }
 0x304   : > { %v3522_v39 = vor.u32 %v3866_v32, %v3521_v31  ;;  %v3361_v32 = vld [vmem:[#allocation4] sm:$0xf] }
 0x305   : > { %v3957_v37 = vpack.i.bf16 %v1741_v34, %v1740_v33  ;;  %v4466_v38 = vpop.permute.xlu1 %1734  ;;  %v3884_v33 = vld [vmem:[#allocation4 + $0x1d4] sm:$0xf0]  ;;  %v3402_v34 = vor.u32 %v3836_v29, %v3401_v28  ;;  %v3561_v28 = vld [vmem:[#allocation4 + $0x190] sm:$0xf] }
 0x306   : > { %v1743_v43 = vadd.f32 %v4466_v38, %v1723_v41  ;;  %v3594_v35 = vor.u32 %v3884_v33, %v3593_v30  ;;  %2338 = vmatpush.bf16.msrb.mxu1 %v3522_v39  ;;  %v3876_v30 = vld [vmem:[#allocation4 + $0x194] sm:$0xf0]  ;;  %v3826_v33 = vld [vmem:[#allocation4 + $0x4] sm:$0xf0] }
 0x307   : > { %3958 = vrot.lane.b32.xlu2 %v3957_v37, %s4083_s20  ;;  %v3458_v37 = vor.u32 %v3850_v25, %v3457_v23  ;;  %2299 = vmatpush.bf16.msra.mxu3 %v3402_v34  ;;  %v3490_v23 = vor.u32 %v3858_v22, %v3489_v20  ;;  %v3369_v25 = vld [vmem:[#allocation4 + $0x10] sm:$0xf]  ;;  %v3562_v31 = vor.u32 %v3876_v30, %v3561_v28  ;;  %v3553_v34 = vld [vmem:[#allocation4 + $0x180] sm:$0xf]  ;;  %v3403_v30 = vld [vmem:[#allocation4 + $0x58] sm:$0xf0] }
 0x308   : > { %v4470_v42 = vpop.permute.xlu0 %1732  ;;  %2356 = vmatpush.bf16.msrb.mxu2 %v3594_v35  ;;  %v3370_v29 = vor.u32 %v3828_v26, %v3369_v25  ;;  %v3362_v35 = vor.u32 %v3826_v33, %v3361_v32  ;;  %v4500_v25 = vperm.slane %v1769_v46, 3 }
 0x309   : > { %v1742_v44 = vadd.f32 %v4470_v42, %v1722_v36  ;;  %2319 = vmatpush.bf16.msrb.mxu0 %v3458_v37  ;;  %v3874_v37 = vld [vmem:[#allocation4 + $0x184] sm:$0xf0] }
 0x30a   : > { %2339 = vmatpush.bf16.msrb.mxu1 %v3514_v51  ;;  %v3554_v39 = vor.u32 %v3874_v37, %v3553_v34  ;;  %v3883_v34 = vld [vmem:[#allocation4 + $0x1d4] sm:$0xf] }
 0x30b   : > { %v3962_v45 = vpack.i.bf16 %v1743_v43, %v1742_v44 }
 0x30d   : > { %3963 = vrot.lane.b32.xlu0 %v3962_v45, %s4083_s20  ;;  %2320 = vmatpush.bf16.msrb.mxu0 %v3450_v49  ;;  %v3475_v49 = vld [vmem:[#allocation4 + $0xe8] sm:$0xf0] }
 0x30e   : > { %2340 = vmatpush.bf16.msrb.mxu1 %v3506_v0  ;;  %v3851_v0 = vld [vmem:[#allocation4 + $0xd4] sm:$0xf] }
 0x30f   : > { %v3470_v2 = vor.u32 %v3851_v0, %v3467_v1  ;;  %v3845_v0 = vld [vmem:[#allocation4 + $0xa4] sm:$0xf]  ;;  %v3443_v1 = vld [vmem:[#allocation4 + $0xa8] sm:$0xf0] }
 0x311   : > { %2321 = vmatpush.bf16.msrb.mxu0 %v3442_v61  ;;  %v4493_v61 = vperm.slane %v1769_v46, 2  ;;  %v3863_v46 = vld [vmem:[#allocation4 + $0x134] sm:$0xf] }
 0x312   : > { %2341 = vmatpush.bf16.msrb.mxu1 %v3498_v12  ;;  %v3414_v12 = vor.u32 %v3837_v7, %v3411_v8 }
 0x315   : > { %2322 = vmatpush.bf16.msrb.mxu0 %v3434_v9  ;;  %v3885_v9 = vld [vmem:[#allocation4 + $0x1e4] sm:$0xf] }
 0x316   : > { %2342 = vmatpush.bf16.msrb.mxu1 %v3490_v23  ;;  %v3523_v23 = vld [vmem:[#allocation4 + $0x148] sm:$0xf0] }
 0x317   : > { %v3526_v28 = vor.u32 %v3865_v18, %v3523_v23  ;;  %v3435_v18 = vld [vmem:[#allocation4 + $0x98] sm:$0xf0]  ;;  %v3829_v23 = vld [vmem:[#allocation4 + $0x24] sm:$0xf] }
 0x319   : > { %2323 = vmatpush.bf16.msrb.mxu0 %v3426_v21 }
 0x361   : > { %v3959_v52 = vpop.permute.xlu2 %3958 }
 0x362   : > { %v3961_v53 = vunpack.i.h.bf16 %v3959_v52  ;;  %v3960_v54 = vunpack.i.l.bf16 %v3959_v52  ;;  %v3393_v52 = vld [vmem:[#allocation4 + $0x40] sm:$0xf] }
 0x364   : > { %v1762_v55 = vsel %vm1760_vm2, %v3961_v53, 0.0  ;;  %v1761_v56 = vsel %vm1760_vm2, %v3960_v54, 0.0  ;;  %v3834_v53 = vld [vmem:[#allocation4 + $0x44] sm:$0xf0] }
 0x365   : > { %v1765_v57 = vpack.c.bf16 %v1762_v55, %v1761_v56  ;;  %v3394_v54 = vor.u32 %v3834_v53, %v3393_v52  ;;  %v3585_v55 = vld [vmem:[#allocation4 + $0x1c0] sm:$0xf]  ;;  %v3882_v56 = vld [vmem:[#allocation4 + $0x1c4] sm:$0xf0]  ;;  %v3478_v52 = vor.u32 %v3853_v48, %v3475_v49  ;;  %v3539_v53 = vld [vmem:[#allocation4 + $0x168] sm:$0xf0] }
 0x367   : > { %3351 = vmatmul.msk.bf16.vlgmr.msrb.gmra.mxu3 %vm598_vm1, %v1765_v57  ;;  %3353 = vmatmul.msk.bf16.vlgmr.msra.gmra.mxu0 %vm598_vm1, %v1765_v57 }
 0x368   : > { %3355 = vmatmul.msk.bf16.vlgmr.msra.gmra.mxu1 %vm598_vm1, %v1765_v57  ;;  %3357 = vmatmul.msk.bf16.vlgmr.msra.gmra.mxu2 %vm598_vm1, %v1765_v57  ;;  %v3586_v57 = vor.u32 %v3882_v56, %v3585_v55  ;;  %v3839_v55 = vld [vmem:[#allocation4 + $0x74] sm:$0xf]  ;;  %v3419_v56 = vld [vmem:[#allocation4 + $0x78] sm:$0xf0] }
 0x369   : > { %2300 = vmatpush.bf16.msra.mxu3 %v3394_v54  ;;  %v3542_v54 = vor.u32 %v3869_v50, %v3539_v53  ;;  %v3422_v59 = vor.u32 %v3839_v55, %v3419_v56  ;;  %v3395_v53 = vld [vmem:[#allocation4 + $0x48] sm:$0xf0] }
 0x36a   : > { %2357 = vmatpush.bf16.msrb.mxu2 %v3586_v57  ;;  %v3887_v57 = vld [vmem:[#allocation4 + $0x1f4] sm:$0xf] }
 0x36b   : > { %v3614_v63 = vor.u32 %v3887_v57, %v3611_v60 }
 0x36d   : > { %2301 = vmatpush.bf16.msra.mxu3 %v3386_v3  ;;  %v3867_v3 = vld [vmem:[#allocation4 + $0x154] sm:$0xf] }
 0x36e   : > { %2358 = vmatpush.bf16.msrb.mxu2 %v3578_v6  ;;  %v3534_v6 = vor.u32 %v3867_v3, %v3531_v4 }
 0x371   : > { %2302 = vmatpush.bf16.msra.mxu3 %v3378_v62  ;;  %v3606_v62 = vor.u32 %v3885_v9, %v3603_v13 }
 0x372   : > { %2359 = vmatpush.bf16.msrb.mxu2 %v3570_v17  ;;  %v3459_v17 = vld [vmem:[#allocation4 + $0xc8] sm:$0xf0] }
 0x373   : > { %v3462_v22 = vor.u32 %v3849_v16, %v3459_v17  ;;  %v3843_v17 = vld [vmem:[#allocation4 + $0x94] sm:$0xf] }
 0x375   : > { %2303 = vmatpush.bf16.msra.mxu3 %v3370_v29  ;;  %v3835_v29 = vld [vmem:[#allocation4 + $0x54] sm:$0xf] }
 0x376   : > { %2360 = vmatpush.bf16.msrb.mxu2 %v3562_v31  ;;  %v3406_v33 = vor.u32 %v3835_v29, %v3403_v30  ;;  %v3877_v30 = vld [vmem:[#allocation4 + $0x1a4] sm:$0xf] }
 0x379   : > { %2304 = vmatpush.bf16.msra.mxu3 %v3362_v35  ;;  %v3595_v35 = vld [vmem:[#allocation4 + $0x1d8] sm:$0xf0] }
 0x37a   : > { %2361 = vmatpush.bf16.msrb.mxu2 %v3554_v39 }
 0x37d   : > { %2373 = vmatpush.bf16.msrb.mxu3 %v3422_v59  ;;  %v3587_v59 = vld [vmem:[#allocation4 + $0x1c8] sm:$0xf0] }
 0x37e   : > { %2430 = vmatpush.bf16.msra.mxu2 %v3614_v63 }
 0x37f   : > { %v3964_v36 = vpop.permute.xlu0 %3963 }
 0x380   : > { %v3966_v40 = vunpack.i.h.bf16 %v3964_v36  ;;  %v3965_v41 = vunpack.i.l.bf16 %v3964_v36  ;;  %v3855_v36 = vld [vmem:[#allocation4 + $0xf4] sm:$0xf] }
 0x381   : > { %2374 = vmatpush.bf16.msrb.mxu3 %v3414_v12 }
 0x382   : > { %v1764_v43 = vsel %vm1760_vm2, %v3966_v40, 0.0  ;;  %v1763_v44 = vsel %vm1760_vm2, %v3965_v41, 0.0  ;;  %v3483_v40 = vld [vmem:[#allocation4 + $0xf8] sm:$0xf0]  ;;  %v3871_v41 = vld [vmem:[#allocation4 + $0x174] sm:$0xf]  ;;  %2431 = vmatpush.bf16.msra.mxu2 %v3606_v62 }
 0x383   : > { %v1766_v45 = vpack.c.bf16 %v1764_v43, %v1763_v44  ;;  %v3486_v43 = vor.u32 %v3855_v36, %v3483_v40  ;;  %v3547_v44 = vld [vmem:[#allocation4 + $0x178] sm:$0xf0]  ;;  %v3598_v36 = vor.u32 %v3883_v34, %v3595_v35  ;;  %v3847_v40 = vld [vmem:[#allocation4 + $0xb4] sm:$0xf]  ;;  %v3427_v34 = vld [vmem:[#allocation4 + $0x88] sm:$0xf0] }
 0x384   : > { %v3857_v35 = vld [vmem:[#allocation4 + $0x104] sm:$0xf] }
 0x385   : > { %3352 = vmatmul.msk.bf16.gmra.mxu3 %vm598_vm1, %v1766_v45  ;;  %3354 = vmatmul.msk.bf16.gmra.mxu0 %vm598_vm1, %v1766_v45 }
 0x386   : > { %3356 = vmatmul.msk.bf16.gmra.mxu1 %vm598_vm1, %v1766_v45  ;;  %3358 = vmatmul.msk.bf16.gmra.mxu2 %vm598_vm1, %v1766_v45  ;;  %v3550_v45 = vor.u32 %v3871_v41, %v3547_v44  ;;  %v3451_v41 = vld [vmem:[#allocation4 + $0xb8] sm:$0xf0] }
 0x387   : > { %2392 = vmatpush.bf16.msra.mxu0 %v3486_v43  ;;  %2375 = vmatpush.bf16.msrb.mxu3 %v3406_v33 }
 0x388   : > { %2411 = vmatpush.bf16.msra.mxu1 %v3550_v45  ;;  %v3454_v45 = vor.u32 %v3847_v40, %v3451_v41  ;;  %2432 = vmatpush.bf16.msra.mxu2 %v3598_v36  ;;  %v3827_v36 = vld [vmem:[#allocation4 + $0x14] sm:$0xf]  ;;  %v3371_v40 = vld [vmem:[#allocation4 + $0x18] sm:$0xf0] }
 0x389   : > { %v3875_v41 = vld [vmem:[#allocation4 + $0x194] sm:$0xf] }
 0x38b   : > { %2393 = vmatpush.bf16.msra.mxu0 %v3478_v52  ;;  %v3833_v52 = vld [vmem:[#allocation4 + $0x44] sm:$0xf] }
 0x38c   : > { %2412 = vmatpush.bf16.msra.mxu1 %v3542_v54  ;;  %v3881_v54 = vld [vmem:[#allocation4 + $0x1c4] sm:$0xf]  ;;  %v3398_v57 = vor.u32 %v3833_v52, %v3395_v53 }
 0x38d   : > { %v3590_v63 = vor.u32 %v3881_v54, %v3587_v59  ;;  %v3873_v52 = vld [vmem:[#allocation4 + $0x184] sm:$0xf] }
 0x38e   : > { %2376 = vmatpush.bf16.msrb.mxu3 %v3398_v57 }
 0x38f   : > { %2394 = vmatpush.bf16.msra.mxu0 %v3470_v2  ;;  %v3861_v2 = vld [vmem:[#allocation4 + $0x124] sm:$0xf]  ;;  %2433 = vmatpush.bf16.msra.mxu2 %v3590_v63 }
 0x390   : > { %2413 = vmatpush.bf16.msra.mxu1 %v3534_v6  ;;  %v3507_v6 = vld [vmem:[#allocation4 + $0x128] sm:$0xf0] }
 0x391   : > { %v3510_v9 = vor.u32 %v3861_v2, %v3507_v6 }
 0x393   : > { %2395 = vmatpush.bf16.msra.mxu0 %v3462_v22  ;;  %v3499_v22 = vld [vmem:[#allocation4 + $0x118] sm:$0xf0] }
 0x394   : > { %2414 = vmatpush.bf16.msra.mxu1 %v3526_v28 }
 0x397   : > { %2396 = vmatpush.bf16.msra.mxu0 %v3454_v45  ;;  %v3563_v45 = vld [vmem:[#allocation4 + $0x198] sm:$0xf0] }
 0x3e4   : > { %v1835_v47 = vpop.f32.mrf.mxu0 }
 0x3e5   : > { %v1854_v51 = vpop.f32.mrf.mxu1  ;;  %v1836_v10 = vadd.f32 %v1835_v47, %v4491_v58  ;;  %v3515_v47 = vld [vmem:[#allocation4 + $0x138] sm:$0xf0] }
 0x3e6   : > { %v1855_v14 = vadd.f32 %v1854_v51, %v4493_v61  ;;  %v3518_v51 = vor.u32 %v3863_v46, %v3515_v47  ;;  %v3374_v46 = vor.u32 %v3827_v36, %v3371_v40  ;;  %v3566_v47 = vor.u32 %v3875_v41, %v3563_v45  ;;  %v3902_v45 = vld [vmem:[%s4651_s13 + $0x68] sm:$0xff] }
 0x3e7   : > { %v1884_v31 = vmax.f32 %v1836_v10, 0.0  ;;  %v3831_v10 = vld [vmem:[#allocation4 + $0x34] sm:$0xf] }
 0x3e8   : > { %v1885_v37 = vmax.f32 %v1855_v14, 0.0  ;;  %2415 = vmatpush.bf16.msra.mxu1 %v3518_v51  ;;  %v3879_v14 = vld [vmem:[#allocation4 + $0x1b4] sm:$0xf]  ;;  %v3363_v51 = vld [vmem:[#allocation4 + $0x8] sm:$0xf0] }
 0x3ea   : > { %v1816_v5 = vpop.f32.mrf.mxu3 }
 0x3eb   : > { %v1873_v11 = vpop.f32.mrf.mxu2  ;;  %v1817_v43 = vadd.f32 %v1816_v5, %v4497_v19  ;;  %v3446_v5 = vor.u32 %v3845_v0, %v3443_v1 }
 0x3ec   : > { %v1837_v15 = vpop.f32.mrf.mxu0  ;;  %v1874_v48 = vadd.f32 %v1873_v11, %v4500_v25  ;;  %v3387_v11 = vld [vmem:[#allocation4 + $0x38] sm:$0xf0]  ;;  %2416 = vmatpush.bf16.msra.mxu1 %v3510_v9 }
 0x3ed   : > { %v1838_v20 = vadd.f32 %v1837_v15, %v4491_v58  ;;  %v1856_v21 = vpop.f32.mrf.mxu1  ;;  %v1883_v3 = vmax.f32 %v1817_v43, 0.0  ;;  %v3390_v13 = vor.u32 %v3831_v10, %v3387_v11  ;;  %v3579_v15 = vld [vmem:[#allocation4 + $0x1b8] sm:$0xf0]  ;;  %2397 = vmatpush.bf16.msra.mxu0 %v3446_v5 }
 0x3ee   : > { %v1857_v26 = vadd.f32 %v1856_v21, %v4493_v61  ;;  %v1886_v7 = vmax.f32 %v1874_v48, 0.0  ;;  %v3582_v16 = vor.u32 %v3879_v14, %v3579_v15  ;;  %v3438_v21 = vor.u32 %v3843_v17, %v3435_v18 }
 0x3ef   : > { %v1888_v32 = vmax.f32 %v1838_v20, 0.0  ;;  %v3859_v20 = vld [vmem:[#allocation4 + $0x114] sm:$0xf]  ;;  %2377 = vmatpush.bf16.msrb.mxu3 %v3390_v13 }
 0x3f0   : > { %v1889_v39 = vmax.f32 %v1857_v26, 0.0  ;;  %v3379_v26 = vld [vmem:[#allocation4 + $0x28] sm:$0xf0]  ;;  %v3502_v28 = vor.u32 %v3859_v20, %v3499_v22  ;;  %2434 = vmatpush.bf16.msra.mxu2 %v3582_v16 }
 0x3f1   : > { %v4504_v44 = vpack.c.bf16 %v1888_v32, %v1884_v31  ;;  %v3382_v29 = vor.u32 %v3829_v23, %v3379_v26  ;;  %v3571_v31 = vld [vmem:[#allocation4 + $0x1a8] sm:$0xf0]  ;;  %v3841_v32 = vld [vmem:[#allocation4 + $0x84] sm:$0xf]  ;;  %2398 = vmatpush.bf16.msra.mxu0 %v3438_v21  ;;  %v1971_v26 = vld [vmem:[%s4650_s12] sm:$0x3] }
 0x3f2   : > { %v4507_v49 = vpack.c.bf16 %v1889_v39, %v1885_v37  ;;  %v1818_v50 = vpop.f32.mrf.mxu3  ;;  %v3574_v33 = vor.u32 %v3877_v30, %v3571_v31  ;;  %v3491_v37 = vld [vmem:[#allocation4 + $0x108] sm:$0xf0]  ;;  %v3430_v39 = vor.u32 %v3841_v32, %v3427_v34  ;;  %2417 = vmatpush.bf16.msra.mxu1 %v3502_v28  ;;  %v3889_v23 = vld [vmem:[%s4651_s13] sm:$0xff]  ;;  %v1973_v28 = vperm.slane %v1971_v26, 0 }
 0x3f3   : > { %v1819_v55 = vadd.f32 %v1818_v50, %v4497_v19  ;;  %v1875_v56 = vpop.f32.mrf.mxu2  ;;  %2324 = vmatmul.bf16.vlgmr.msrb.gmra.mxu0 %v4504_v44  ;;  %v3494_v43 = vor.u32 %v3857_v35, %v3491_v37  ;;  %2378 = vmatpush.bf16.msrb.mxu3 %v3382_v29  ;;  %v3825_v50 = vld [vmem:[#allocation4 + $0x4] sm:$0xf]  ;;  %v3890_v22 = vld [vmem:[%s4651_s13 + $0x8] sm:$0xff]  ;;  %v3903_v37 = vld [vmem:[%s4651_s13 + $0x70] sm:$0xff] }
 0x3f4   : > { %v1876_v60 = vadd.f32 %v1875_v56, %v4500_v25  ;;  %2343 = vmatmul.bf16.vlgmr.msrb.gmra.mxu1 %v4507_v49  ;;  %2435 = vmatpush.bf16.msra.mxu2 %v3574_v33  ;;  %v3366_v54 = vor.u32 %v3825_v50, %v3363_v51  ;;  %v3904_v33 = vld [vmem:[%s4651_s13 + $0x78] sm:$0xff] }
 0x3f5   : > { %v1887_v4 = vmax.f32 %v1819_v55, 0.0  ;;  %2399 = vmatpush.bf16.msra.mxu0 %v3430_v39  ;;  %v3555_v55 = vld [vmem:[#allocation4 + $0x188] sm:$0xf0] }
 0x3f6   : > { %v1890_v8 = vmax.f32 %v1876_v60, 0.0  ;;  %2418 = vmatpush.bf16.msra.mxu1 %v3494_v43  ;;  %v3558_v56 = vor.u32 %v3873_v52, %v3555_v55  ;;  %v3901_v52 = vld [vmem:[%s4651_s13 + $0x60] sm:$0xff] }
 0x3f7   : > { %v4513_v12 = vpack.c.bf16 %v1887_v4, %v1883_v3  ;;  %2379 = vmatpush.bf16.msrb.mxu3 %v3374_v46 }
 0x3f8   : > { %v4515_v62 = vpack.c.bf16 %v1890_v8, %v1886_v7  ;;  %2436 = vmatpush.bf16.msra.mxu2 %v3566_v47 }
 0x3f9   : > { %2305 = vmatmul.bf16.vlgmr.msra.gmra.mxu3 %v4513_v12  ;;  %2612 = vmatpush.bf16.msrb.mxu0 %v3904_v33 }
 0x3fa   : > { %2362 = vmatmul.bf16.vlgmr.msrb.gmra.mxu2 %v4515_v62 }
 0x3fb   : > { %2380 = vmatpush.bf16.msrb.mxu3 %v3366_v54 }
 0x3fc   : > { %2437 = vmatpush.bf16.msra.mxu2 %v3558_v56  ;;  %v3900_v56 = vld [vmem:[%s4651_s13 + $0x58] sm:$0xff] }
 0x3fd   : > { %2613 = vmatpush.bf16.msrb.mxu0 %v3903_v37 }
 0x401   : > { %2614 = vmatpush.bf16.msrb.mxu0 %v3902_v45 }
 0x402   : > { %v1840_v48 = vpop.f32.mrf.mxu0 }
 0x403   : > { %v1859_v53 = vpop.f32.mrf.mxu1  ;;  %v1841_v59 = vadd.f32 %v1840_v48, %v4491_v58 }
 0x404   : > { %v1860_v63 = vadd.f32 %v1859_v53, %v4493_v61 }
 0x405   : > { %v1892_v4 = vmax.f32 %v1841_v59, 0.0  ;;  %2615 = vmatpush.bf16.msrb.mxu0 %v3901_v52  ;;  %v3899_v59 = vld [vmem:[%s4651_s13 + $0x50] sm:$0xff] }
 0x406   : > { %v1893_v6 = vmax.f32 %v1860_v63, 0.0  ;;  %v3898_v63 = vld [vmem:[%s4651_s13 + $0x48] sm:$0xff] }
 0x408   : > { %v1821_v57 = vpop.f32.mrf.mxu3 }
 0x409   : > { %v1878_v60 = vpop.f32.mrf.mxu2  ;;  %v1822_v8 = vadd.f32 %v1821_v57, %v4497_v19  ;;  %2616 = vmatpush.bf16.msrb.mxu0 %v3900_v56 }
 0x40a   : > { %v1842_v0 = vpop.f32.mrf.mxu0  ;;  %v1879_v10 = vadd.f32 %v1878_v60, %v4500_v25 }
 0x40b   : > { %v1843_v1 = vadd.f32 %v1842_v0, %v4491_v58  ;;  %v1861_v2 = vpop.f32.mrf.mxu1  ;;  %v1891_v16 = vmax.f32 %v1822_v8, 0.0 }
 0x40c   : > { %v1862_v3 = vadd.f32 %v1861_v2, %v4493_v61  ;;  %v1894_v17 = vmax.f32 %v1879_v10, 0.0 }
 0x40d   : > { %v1896_v5 = vmax.f32 %v1843_v1, 0.0  ;;  %2617 = vmatpush.bf16.msrb.mxu0 %v3899_v59  ;;  %v3912_v59 = vld [vmem:[%s4653_s15 + $0x38] sm:$0xff] }
 0x40e   : > { %v1897_v7 = vmax.f32 %v1862_v3, 0.0  ;;  %v3897_v3 = vld [vmem:[%s4651_s13 + $0x40] sm:$0xff]  ;;  %2705 = vmatpush.bf16.msrb.mxu1 %v3912_v59  ;;  %3913 = vmatpush.bf16.msrb.mxu2 %v3912_v59 }
 0x40f   : > { %v1904_v9 = vpack.c.bf16 %v1896_v5, %v1892_v4 }
 0x410   : > { %v1823_v11 = vpop.f32.mrf.mxu3  ;;  %v1905_v13 = vpack.c.bf16 %v1897_v7, %v1893_v6 }
 0x411   : > { %v1824_v14 = vadd.f32 %v1823_v11, %v4497_v19  ;;  %v1880_v15 = vpop.f32.mrf.mxu2  ;;  %2329 = vmatmul.bf16.gmra.mxu0 %v1904_v9  ;;  %v3896_v19 = vld [vmem:[%s4651_s13 + $0x38] sm:$0xff] }
 0x412   : > { %v1881_v58 = vadd.f32 %v1880_v15, %v4500_v25  ;;  %2348 = vmatmul.bf16.gmra.mxu1 %v1905_v13  ;;  %2593 = vmatpush.bf16.msra.mxu3 %v3896_v19  ;;  %v3895_v25 = vld [vmem:[%s4651_s13 + $0x30] sm:$0xff] }
 0x413   : > { %v1895_v61 = vmax.f32 %v1824_v14, 0.0  ;;  %2618 = vmatpush.bf16.msrb.mxu0 %v3898_v63  ;;  %v3910_v63 = vld [vmem:[%s4653_s15 + $0x28] sm:$0xff] }
 0x414   : > { %v1898_v18 = vmax.f32 %v1881_v58, 0.0  ;;  %v1974_v58 = vperm.slane %v1971_v26, 1 }
 0x415   : > { %v1903_v20 = vpack.c.bf16 %v1895_v61, %v1891_v16 }
 0x416   : > { %v1906_v21 = vpack.c.bf16 %v1898_v18, %v1894_v17  ;;  %2594 = vmatpush.bf16.msra.mxu3 %v3895_v25 }
 0x417   : > { %2310 = vmatmul.bf16.gmra.mxu3 %v1903_v20  ;;  %2619 = vmatpush.bf16.msrb.mxu0 %v3897_v3  ;;  %v3906_v3 = vld [vmem:[%s4653_s15 + $0x8] sm:$0xff] }
 0x418   : > { %2367 = vmatmul.bf16.gmra.mxu2 %v1906_v21 }
 0x421   : > { %2400 = vmatmul.bf16.vlgmr.msra.gmra.mxu0 %v4504_v44  ;;  %v3894_v44 = vld [vmem:[%s4651_s13 + $0x28] sm:$0xff] }
 0x422   : > { %2419 = vmatmul.bf16.vlgmr.msra.gmra.mxu1 %v4507_v49  ;;  %2595 = vmatpush.bf16.msra.mxu3 %v3894_v44  ;;  %v3893_v49 = vld [vmem:[%s4651_s13 + $0x20] sm:$0xff] }
 0x426   : > { %2596 = vmatpush.bf16.msra.mxu3 %v3893_v49 }
 0x427   : > { %2381 = vmatmul.bf16.vlgmr.msrb.gmra.mxu3 %v4513_v12  ;;  %v3892_v12 = vld [vmem:[%s4651_s13 + $0x18] sm:$0xff] }
 0x428   : > { %2438 = vmatmul.bf16.vlgmr.msra.gmra.mxu2 %v4515_v62  ;;  %v3891_v62 = vld [vmem:[%s4651_s13 + $0x10] sm:$0xff] }
 0x42a   : > { %2597 = vmatpush.bf16.msra.mxu3 %v3892_v12 }
 0x42e   : > { %2598 = vmatpush.bf16.msra.mxu3 %v3891_v62 }
 0x431   : > { %2405 = vmatmul.bf16.gmra.mxu0 %v1904_v9 }
 0x432   : > { %2424 = vmatmul.bf16.gmra.mxu1 %v1905_v13  ;;  %2599 = vmatpush.bf16.msra.mxu3 %v3890_v22 }
 0x436   : > { %2600 = vmatpush.bf16.msra.mxu3 %v3889_v23 }
 0x437   : > { %2386 = vmatmul.bf16.gmra.mxu3 %v1903_v20 }
 0x438   : > { %2443 = vmatmul.bf16.gmra.mxu2 %v1906_v21 }
 0x470   : > { %v2325_v29 = vpop.f32.mrf.mxu0 }
 0x471   : > { %v2344_v32 = vpop.f32.mrf.mxu1 }
 0x478   : > { %v2327_v41 = vpop.f32.mrf.mxu0 }
 0x479   : > { %v2346_v46 = vpop.f32.mrf.mxu1 }
 0x47c   : > { %v2306_v30 = vpop.f32.mrf.mxu3 }
 0x47d   : > { %v2307_v31 = vadd.f32 %v2306_v30, %v1973_v28  ;;  %v2363_v34 = vpop.f32.mrf.mxu2 }
 0x47f   : > { %v2326_v35 = vadd.f32 %v2325_v29, %v2307_v31 }
 0x481   : > { %v2345_v36 = vadd.f32 %v2344_v32, %v2326_v35 }
 0x483   : > { %v2364_v47 = vadd.f32 %v2363_v34, %v2345_v36 }
 0x484   : > { %v2308_v39 = vpop.f32.mrf.mxu3 }
 0x485   : > { %v2309_v40 = vadd.f32 %v2308_v39, %v1973_v28  ;;  %v2365_v50 = vpop.f32.mrf.mxu2  ;;  %v2449_v53 = vmax.f32 %v2364_v47, 0.0 }
 0x487   : > { %v2328_v43 = vadd.f32 %v2327_v41, %v2309_v40 }
 0x489   : > { %v2347_v48 = vadd.f32 %v2346_v46, %v2328_v43 }
 0x48b   : > { %v2366_v51 = vadd.f32 %v2365_v50, %v2347_v48 }
 0x48d   : > { %v2451_v54 = vmax.f32 %v2366_v51, 0.0 }
 0x48e   : > { %v2330_v57 = vpop.f32.mrf.mxu0 }
 0x48f   : > { %v2457_v55 = vpack.c.bf16 %v2451_v54, %v2449_v53  ;;  %v2349_v60 = vpop.f32.mrf.mxu1 }
 0x491   : > { %2601 = vmatmul.bf16.vlgmr.msra.gmra.mxu3 %v2457_v55 }
 0x496   : > { %v2332_v4 = vpop.f32.mrf.mxu0 }
 0x497   : > { %v2351_v5 = vpop.f32.mrf.mxu1 }
 0x49a   : > { %v2311_v0 = vpop.f32.mrf.mxu3 }
 0x49b   : > { %v2312_v1 = vadd.f32 %v2311_v0, %v1973_v28  ;;  %v2368_v2 = vpop.f32.mrf.mxu2  ;;  %v3909_v0 = vld [vmem:[%s4653_s15 + $0x20] sm:$0xff] }
 0x49d   : > { %v2331_v6 = vadd.f32 %v2330_v57, %v2312_v1  ;;  %v3908_v1 = vld [vmem:[%s4653_s15 + $0x18] sm:$0xff] }
 0x49e   : > { %v2401_v13 = vpop.f32.mrf.mxu0 }
 0x49f   : > { %v2350_v8 = vadd.f32 %v2349_v60, %v2331_v6  ;;  %v2420_v16 = vpop.f32.mrf.mxu1  ;;  %v3911_v60 = vld [vmem:[%s4653_s15 + $0x30] sm:$0xff] }
 0x4a0   : > { %2706 = vmatpush.bf16.msrb.mxu1 %v3911_v60  ;;  %3914 = vmatpush.bf16.msrb.mxu2 %v3911_v60 }
 0x4a1   : > { %v2369_v14 = vadd.f32 %v2368_v2, %v2350_v8  ;;  %v3907_v2 = vld [vmem:[%s4653_s15 + $0x10] sm:$0xff] }
 0x4a2   : > { %v2313_v7 = vpop.f32.mrf.mxu3 }
 0x4a3   : > { %v2314_v9 = vadd.f32 %v2313_v7, %v1973_v28  ;;  %v2370_v10 = vpop.f32.mrf.mxu2  ;;  %v2453_v18 = vmax.f32 %v2369_v14, 0.0  ;;  %v3969_v7 = vld [vmem:[%s4652_s14] ss:$0 sm:$0xff] }
 0x4a4   : > { %2707 = vmatpush.bf16.msrb.mxu1 %v3910_v63  ;;  %3915 = vmatpush.bf16.msrb.mxu2 %v3910_v63 }
 0x4a5   : > { %v2333_v11 = vadd.f32 %v2332_v4, %v2314_v9  ;;  %v3905_v4 = vld [vmem:[%s4653_s15] sm:$0xff] }
 0x4a6   : > { %v2403_v49 = vpop.f32.mrf.mxu0 }
 0x4a7   : > { %v2352_v15 = vadd.f32 %v2351_v5, %v2333_v11  ;;  %v2422_v12 = vpop.f32.mrf.mxu1 }
 0x4a8   : > { %2708 = vmatpush.bf16.msrb.mxu1 %v3909_v0  ;;  %3916 = vmatpush.bf16.msrb.mxu2 %v3909_v0 }
 0x4a9   : > { %v2371_v61 = vadd.f32 %v2370_v10, %v2352_v15 }
 0x4aa   : > { %v2382_v17 = vpop.f32.mrf.mxu3 }
 0x4ab   : > { %v2455_v20 = vmax.f32 %v2371_v61, 0.0  ;;  %v2383_v21 = vadd.f32 %v2382_v17, %v1974_v58  ;;  %v2439_v19 = vpop.f32.mrf.mxu2 }
 0x4ac   : > { %2709 = vmatpush.bf16.msrb.mxu1 %v3908_v1  ;;  %3917 = vmatpush.bf16.msrb.mxu2 %v3908_v1 }
 0x4ad   : > { %v2459_v25 = vpack.c.bf16 %v2455_v20, %v2453_v18  ;;  %v2402_v44 = vadd.f32 %v2401_v13, %v2383_v21 }
 0x4ae   : > { %v2406_v32 = vpop.f32.mrf.mxu0 }
 0x4af   : > { %2606 = vmatmul.bf16.gmra.mxu3 %v2459_v25  ;;  %v2421_v22 = vadd.f32 %v2420_v16, %v2402_v44  ;;  %v2425_v39 = vpop.f32.mrf.mxu1 }
 0x4b0   : > { %2710 = vmatpush.bf16.msrb.mxu1 %v3907_v2  ;;  %3918 = vmatpush.bf16.msrb.mxu2 %v3907_v2 }
 0x4b1   : > { %v2440_v30 = vadd.f32 %v2439_v19, %v2421_v22  ;;  %v3970_v22 = vld [vmem:[%s4654_s16] ss:$0 sm:$0xff] }
 0x4b2   : > { %v2384_v62 = vpop.f32.mrf.mxu3 }
 0x4b3   : > { %v2385_v23 = vadd.f32 %v2384_v62, %v1974_v58  ;;  %v2441_v28 = vpop.f32.mrf.mxu2  ;;  %v2450_v34 = vmax.f32 %v2440_v30, 0.0 }
 0x4b4   : > { %2711 = vmatpush.bf16.msrb.mxu1 %v3906_v3  ;;  %3919 = vmatpush.bf16.msrb.mxu2 %v3906_v3 }
 0x4b5   : > { %v2404_v29 = vadd.f32 %v2403_v49, %v2385_v23 }
 0x4b6   : > { %v2408_v47 = vpop.f32.mrf.mxu0 }
 0x4b7   : > { %v2423_v31 = vadd.f32 %v2422_v12, %v2404_v29  ;;  %v2427_v50 = vpop.f32.mrf.mxu1 }
 0x4b8   : > { %2712 = vmatpush.bf16.msrb.mxu1 %v3905_v4  ;;  %3920 = vmatpush.bf16.msrb.mxu2 %v3905_v4 }
 0x4b9   : > { %v2442_v26 = vadd.f32 %v2441_v28, %v2423_v31 }
 0x4ba   : > { %v2387_v33 = vpop.f32.mrf.mxu3 }
 0x4bb   : > { %v2452_v35 = vmax.f32 %v2442_v26, 0.0  ;;  %v2388_v37 = vadd.f32 %v2387_v33, %v1974_v58  ;;  %v2444_v40 = vpop.f32.mrf.mxu2 }
 0x4bd   : > { %v2458_v36 = vpack.c.bf16 %v2452_v35, %v2450_v34  ;;  %v2407_v41 = vadd.f32 %v2406_v32, %v2388_v37 }
 0x4bf   : > { %2620 = vmatmul.bf16.vlgmr.msrb.gmra.mxu0 %v2458_v36  ;;  %v2426_v45 = vadd.f32 %v2425_v39, %v2407_v41 }
 0x4c1   : > { %v2445_v51 = vadd.f32 %v2444_v40, %v2426_v45 }
 0x4c2   : > { %v2389_v43 = vpop.f32.mrf.mxu3 }
 0x4c3   : > { %v2390_v46 = vadd.f32 %v2389_v43, %v1974_v58  ;;  %v2446_v53 = vpop.f32.mrf.mxu2  ;;  %v2454_v55 = vmax.f32 %v2445_v51, 0.0 }
 0x4c5   : > { %v2409_v48 = vadd.f32 %v2408_v47, %v2390_v46 }
 0x4c7   : > { %v2428_v52 = vadd.f32 %v2427_v50, %v2409_v48 }
 0x4c9   : > { %v2447_v54 = vadd.f32 %v2446_v53, %v2428_v52 }
 0x4cb   : > { %v2456_v56 = vmax.f32 %v2447_v54, 0.0 }
 0x4cd   : > { %v2460_v57 = vpack.c.bf16 %v2456_v56, %v2454_v55 }
 0x4cf   : > { %2625 = vmatmul.bf16.gmra.mxu0 %v2460_v57 }
 0x514   : > { %v2602_v5 = vpop.f32.mrf.mxu3 }
 0x515   : > { %v2603_v9 = vadd.f32 %v3969_v7, %v2602_v5 }
 0x51c   : > { %v2604_v8 = vpop.f32.mrf.mxu3 }
 0x51d   : > { %v2605_v10 = vadd.f32 %v3969_v7, %v2604_v8 }
 0x532   : > { %v2607_v15 = vpop.f32.mrf.mxu3 }
 0x533   : > { %v2608_v20 = vadd.f32 %v3969_v7, %v2607_v15 }
 0x53a   : > { %v2609_v18 = vpop.f32.mrf.mxu3 }
 0x53b   : > { %v2610_v21 = vadd.f32 %v3969_v7, %v2609_v18 }
 0x53c   : > { %v2621_v6 = vpop.f32.mrf.mxu0 }
 0x53d   : > { %v2622_v11 = vadd.f32 %v2621_v6, %v2603_v9 }
 0x53f   : > { %v2631_v58 = vmax.f32 %v2622_v11, 0.0 }
 0x544   : > { %v2623_v13 = vpop.f32.mrf.mxu0 }
 0x545   : > { %v2624_v14 = vadd.f32 %v2623_v13, %v2605_v10 }
 0x547   : > { %v2632_v16 = vmax.f32 %v2624_v14, 0.0 }
 0x549   : > { %v2635_v61 = vpack.c.bf16 %v2632_v16, %v2631_v58 }
 0x54b   : > { %2713 = vmatmul.bf16.vlgmr.msrb.gmra.mxu1 %v2635_v61 }
 0x54c   : > { %v2626_v17 = vpop.f32.mrf.mxu0 }
 0x54d   : > { %v2627_v19 = vadd.f32 %v2626_v17, %v2608_v20 }
 0x54f   : > { %v2633_v49 = vmax.f32 %v2627_v19, 0.0 }
 0x554   : > { %v2628_v25 = vpop.f32.mrf.mxu0 }
 0x555   : > { %v2629_v44 = vadd.f32 %v2628_v25, %v2610_v21 }
 0x557   : > { %v2634_v12 = vmax.f32 %v2629_v44, 0.0 }
 0x559   : > { %v2636_v62 = vpack.c.bf16 %v2634_v12, %v2633_v49 }
 0x55b   : > { %2718 = vmatmul.bf16.vlgmr.msrb.gmra.mxu2 %v2636_v62 }
 0x5c8   : > { %v2714_v23 = vpop.f32.mrf.mxu1 }
 0x5c9   : > { %v2715_v28 = vadd.f32 %v3970_v22, %v2714_v23 }
 0x5cb   : > { %v2724_v29 = vsub.f32 0.0, %v2715_v28 }
 0x5cd   : > { %v2728_v30 = vmul.f32 1.442695, %v2724_v29 }
 0x5cf   : > { %3979 = vpow2.f32 %v2728_v30 }
 0x5d0   : > { %v2716_v31 = vpop.f32.mrf.mxu1 }
 0x5d1   : > { %v2717_v26 = vadd.f32 %v3970_v22, %v2716_v31 }
 0x5d3   : > { %v2725_v32 = vsub.f32 0.0, %v2717_v26 }
 0x5d5   : > { %v3980_v33 = vpop.eup %3979  ;;  %v2730_v34 = vmul.f32 1.442695, %v2725_v32 }
 0x5d6   : > { %v2736_v35 = vadd.f32 1.0, %v3980_v33 }
 0x5d7   : > { %3981 = vpow2.f32 %v2730_v34 }
 0x5d8   : > { %3983 = vrcp.f32 %v2736_v35  ;;  %v2751_v47 = vand.u32 2147483648, %v2736_v35  ;;  %v2749_v50 = vand.u32 2147483647, %v2736_v35  ;;  %vm2745_vm4 = vweird.f32 %v2736_v35 }
 0x5da   : > { %v2752_v54 = vor.u32 1.1754944e-38, %v2751_v47  ;;  %vm2750_vm8 = vcmp.eq.f32.partialorder %v2749_v50, 8.507059e+37 }
 0x5dd   : > { %v3982_v37 = vpop.eup %3981 }
 0x5de   : > { %v3984_v39 = vpop.eup %3983  ;;  %v2737_v36 = vadd.f32 1.0, %v3982_v37  ;;  %v2719_v40 = vpop.f32.mrf.mxu2 }
 0x5df   : > { %v2741_v41 = vmul.f32 %v3984_v39, %v2736_v35  ;;  %v2720_v43 = vadd.f32 %v3970_v22, %v2719_v40  ;;  %vm2746_vm3 = vweird.f32 %v3984_v39 }
 0x5e0   : > { %3985 = vrcp.f32 %v2737_v36  ;;  %vm2747_vm5 = vmor %vm2745_vm4, %vm2746_vm3  ;;  %v2766_v2 = vand.u32 2147483648, %v2737_v36  ;;  %v2764_v5 = vand.u32 2147483647, %v2737_v36  ;;  %vm2760_vm10 = vweird.f32 %v2737_v36 }
 0x5e1   : > { %v2742_v45 = vsub.f32 1.0, %v2741_v41  ;;  %v2726_v46 = vsub.f32 0.0, %v2720_v43 }
 0x5e2   : > { %v2767_v9 = vor.u32 1.1754944e-38, %v2766_v2  ;;  %vm2765_vm12 = vcmp.eq.f32.partialorder %v2764_v5, 8.507059e+37 }
 0x5e3   : > { %v2743_v48 = vmul.f32 %v3984_v39, %v2742_v45  ;;  %v2732_v51 = vmul.f32 1.442695, %v2726_v46 }
 0x5e5   : > { %v2744_v52 = vadd.f32 %v3984_v39, %v2743_v48  ;;  %3987 = vpow2.f32 %v2732_v51 }
 0x5e6   : > { %v3986_v53 = vpop.eup %3985  ;;  %v2721_v55 = vpop.f32.mrf.mxu2 }
 0x5e7   : > { %v2748_v56 = vsel %vm2747_vm5, %v3984_v39, %v2744_v52  ;;  %v2756_v57 = vmul.f32 %v3986_v53, %v2737_v36  ;;  %v2722_v59 = vadd.f32 %v3970_v22, %v2721_v55  ;;  %vm2761_vm9 = vweird.f32 %v3986_v53 }
 0x5e8   : > { %v2753_v60 = vsel %vm2750_vm8, %v2752_v54, %v2748_v56  ;;  %vm2762_vm11 = vmor %vm2760_vm10, %vm2761_vm9 }
 0x5e9   : > { %v2801_v63 = vsel %vm2800_vm6, %v2753_v60, %v4458_v24  ;;  %v2757_v0 = vsub.f32 1.0, %v2756_v57  ;;  %v2727_v1 = vsub.f32 0.0, %v2722_v59 }
 0x5ea   : > { %2806 = vst.msk [vmem:[%s4617_s25] sm:$0xff] %vm2805_vm7, %v2801_v63 }
 0x5eb   : > { %v3988_v3 = vpop.eup %3987  ;;  %v2758_v4 = vmul.f32 %v3986_v53, %v2757_v0  ;;  %v2734_v6 = vmul.f32 1.442695, %v2727_v1 }
 0x5ec   : > { %v2738_v7 = vadd.f32 1.0, %v3988_v3 }
 0x5ed   : > { %v2759_v8 = vadd.f32 %v3986_v53, %v2758_v4  ;;  %3989 = vpow2.f32 %v2734_v6 }
 0x5ee   : > { %3991 = vrcp.f32 %v2738_v7  ;;  %v2781_v61 = vand.u32 2147483648, %v2738_v7  ;;  %v2779_v18 = vand.u32 2147483647, %v2738_v7  ;;  %vm2775_vm14 = vweird.f32 %v2738_v7 }
 0x5ef   : > { %v2763_v10 = vsel %vm2762_vm11, %v3986_v53, %v2759_v8 }
 0x5f0   : > { %v2768_v24 = vsel %vm2765_vm12, %v2767_v9, %v2763_v10  ;;  %v2782_v19 = vor.u32 1.1754944e-38, %v2781_v61  ;;  %vm2780_vm0 = vcmp.eq.f32.partialorder %v2779_v18, 8.507059e+37 }
 0x5f1   : > { %v2802_v11 = vsel %vm2800_vm6, %v2768_v24, %v4460_v27 }
 0x5f2   : > { %2807 = vst.msk [vmem:[%s4617_s25 + $0x8] sm:$0xff] %vm2805_vm7, %v2802_v11 }
 0x5f3   : > { %v3990_v13 = vpop.eup %3989 }
 0x5f4   : > { %v3992_v14 = vpop.eup %3991  ;;  %v2739_v15 = vadd.f32 1.0, %v3990_v13 }
 0x5f5   : > { %v2771_v58 = vmul.f32 %v3992_v14, %v2738_v7  ;;  %vm2776_vm13 = vweird.f32 %v3992_v14 }
 0x5f6   : > { %3993 = vrcp.f32 %v2739_v15  ;;  %vm2777_vm15 = vmor %vm2775_vm14, %vm2776_vm13  ;;  %v2796_v62 = vand.u32 2147483648, %v2739_v15  ;;  %v2794_v23 = vand.u32 2147483647, %v2739_v15  ;;  %vm2790_vm2 = vweird.f32 %v2739_v15 }
 0x5f7   : > { %v2772_v16 = vsub.f32 1.0, %v2771_v58 }
 0x5f8   : > { %v2797_v29 = vor.u32 1.1754944e-38, %v2796_v62  ;;  %vm2795_vm4 = vcmp.eq.f32.partialorder %v2794_v23, 8.507059e+37 }
 0x5f9   : > { %v2773_v17 = vmul.f32 %v3992_v14, %v2772_v16 }
 0x5fb   : > { %v2774_v20 = vadd.f32 %v3992_v14, %v2773_v17 }
 0x5fc   : > { %v3994_v21 = vpop.eup %3993 }
 0x5fd   : > { %v2778_v25 = vsel %vm2777_vm15, %v3992_v14, %v2774_v20  ;;  %v2786_v27 = vmul.f32 %v3994_v21, %v2739_v15  ;;  %vm2791_vm1 = vweird.f32 %v3994_v21 }
 0x5fe   : > { %v2783_v44 = vsel %vm2780_vm0, %v2782_v19, %v2778_v25  ;;  %vm2792_vm3 = vmor %vm2790_vm2, %vm2791_vm1 }
 0x5ff   : > { %v2803_v49 = vsel %vm2800_vm6, %v2783_v44, %v4470_v42  ;;  %v2787_v12 = vsub.f32 1.0, %v2786_v27 }
 0x600   : > { %2808 = vst.msk [vmem:[%s4617_s25 + $0x10] sm:$0xff] %vm2805_vm7, %v2803_v49 }
 0x601   : > { %v2788_v22 = vmul.f32 %v3994_v21, %v2787_v12 }
 0x603   : > { %v2789_v28 = vadd.f32 %v3994_v21, %v2788_v22 }
 0x605   : > { %v2793_v30 = vsel %vm2792_vm3, %v3994_v21, %v2789_v28 }
 0x606   : > { %v2798_v31 = vsel %vm2795_vm4, %v2797_v29, %v2793_v30 }
 0x607   : > { %v2804_v26 = vsel %vm2800_vm6, %v2798_v31, %v4466_v38 }
 0x608   : > { %2809 = vst.msk [vmem:[%s4617_s25 + $0x18] sm:$0xff] %vm2805_vm7, %v2804_v26 }
 0x609 PF: > { %s29_s24 = sadd.s32 1, %s4073_s24  }
 0x60a   : > { %p26_p7 = scmp.ge.s32.totalorder %s29_s24, 4  }
 0x60c   :  { %28 = sbr.rel (!%p26_p7) target bundleno = 6 (0x6), region = 127 }
 0x611   :  { %2832 = vsyncpa [#allocation3], 1 }
 0x612   :  { %2834 = vsyncpa [#allocation3 + $0x1], 1 }
 0x613   :  { %2835 = vsyncpa [#allocation5], 1 }

</bundles_post_ra>
